<compile_context>
chip_gen: v5e
topology: v5e:2x2
jax: 0.10.0
libtpu: 0.0.40
codegen_flags: <defaults>
</compile_context>

<pallas_src>
import functools
import math

import jax
import jax.numpy as jnp
from jax.experimental import pallas as pl
from jax.experimental.pallas import tpu as pltpu


def _encoder_layer_kernel(
    x_ref,                                  # (TB, S, D) f32
    wqkv_ref, bqkv_ref,                     # (D, 3D) bf16, (1, 3D) f32
    wo_ref, bo_ref,                         # (D, D) bf16, (1, D) f32
    g1_ref, beta1_ref,                      # (1, D) f32
    w1_ref, bf1_ref,                        # (D, F) bf16, (1, F) f32
    w2_ref, bf2_ref,                        # (F, D) bf16, (1, D) f32
    g2_ref, beta2_ref,                      # (1, D) f32
    o_ref,                                  # (TB, S, D) f32
    *, nhead: int, eps: float,
):
    TB, S, D = x_ref.shape
    M = TB * S
    hd = D // nhead

    x = x_ref[...].reshape(M, D)            # f32 activations (residual path stays f32)
    x_bf = x.astype(jnp.bfloat16)

    # ---- fused QKV projection: one wide bf16 MXU matmul, f32 accumulation ----
    # 1/sqrt(hd) is already folded into the Q columns of wqkv / bqkv.
    qkv = jnp.dot(x_bf, wqkv_ref[...], preferred_element_type=jnp.float32) + bqkv_ref[...]
    q3 = qkv[:, 0:D].reshape(TB, S, D).astype(jnp.bfloat16)
    k3 = qkv[:, D:2 * D].reshape(TB, S, D).astype(jnp.bfloat16)
    v3 = qkv[:, 2 * D:3 * D].reshape(TB, S, D).astype(jnp.bfloat16)

    # ---- multi-head attention, batched over the TB batch elements per head ----
    # NOTE: per-head lane slices are tile-aligned (free) whenever hd % 128 == 0; for
    # small hd they are sub-tile slices, still correct but XLU-assisted.
    head_outs = []
    for h in range(nhead):                  # static unrolled loop (nhead is small)
        lo = h * hd
        qh = q3[:, :, lo:lo + hd]           # (TB, S, hd) bf16 (already scaled)
        kh = k3[:, :, lo:lo + hd]
        vh = v3[:, :, lo:lo + hd]
        s = jnp.einsum("bqd,bkd->bqk", qh, kh,
                       preferred_element_type=jnp.float32)          # (TB, S, S) f32
        s = s - jnp.max(s, axis=-1, keepdims=True)
        p = jnp.exp(s)
        p = p * pl.reciprocal(jnp.sum(p, axis=-1, keepdims=True), approx=True)
        head_outs.append(
            jnp.einsum("bqk,bkd->bqd", p.astype(jnp.bfloat16), vh,
                       preferred_element_type=jnp.float32))         # (TB, S, hd) f32

    # head concat once, then ONE full-K output projection (instead of nhead K=hd dots)
    o_cat = jnp.concatenate(head_outs, axis=-1).reshape(M, D).astype(jnp.bfloat16)
    attn = jnp.dot(o_cat, wo_ref[...], preferred_element_type=jnp.float32) + bo_ref[...]

    # ---- residual + GroupLayerNorm(nb=1) #1  (f32) ---------------------------
    h1 = x + attn
    mu = jnp.mean(h1, axis=-1, keepdims=True)
    var = jnp.mean((h1 - mu) ** 2, axis=-1, keepdims=True)
    h1 = (h1 - mu) * jax.lax.rsqrt(var + eps)
    h1 = h1 * g1_ref[...] + beta1_ref[...]

    # ---- position-wise feed-forward (bf16 MXU, f32 accumulate) ---------------
    f = jnp.dot(h1.astype(jnp.bfloat16), w1_ref[...],
                preferred_element_type=jnp.float32) + bf1_ref[...]
    f = jnp.maximum(f, 0.0)                 # ReLU
    f = jnp.dot(f.astype(jnp.bfloat16), w2_ref[...],
                preferred_element_type=jnp.float32) + bf2_ref[...]

    # ---- residual + GroupLayerNorm(nb=1) #2  (f32) ---------------------------
    h2 = h1 + f
    mu2 = jnp.mean(h2, axis=-1, keepdims=True)
    var2 = jnp.mean((h2 - mu2) ** 2, axis=-1, keepdims=True)
    h2 = (h2 - mu2) * jax.lax.rsqrt(var2 + eps)
    h2 = h2 * g2_ref[...] + beta2_ref[...]

    o_ref[...] = h2.reshape(TB, S, D).astype(o_ref.dtype)


def _pick_block_b(B: int, S: int) -> int:
    """Largest batch block with <=~256 rows per step while keeping >=2 grid steps
    (so the batch axis can still be sharded across v7x's two TensorCores)."""
    best = 1
    for cand in range(1, B + 1):
        if B % cand:
            continue
        if cand > 1 and cand * S > 256:
            continue
        if B >= 2 and B // cand < 2:
            continue
        best = cand
    return best


def _make_call(B, S, D, F, TB, nhead, eps, single_buffer_weights):
    kern = functools.partial(_encoder_layer_kernel, nhead=nhead, eps=eps)

    # Constant-index weights never change block: single-buffer them to halve their
    # VMEM residency (important on v7x's 64 MiB VMEM).
    wkw = {"pipeline_mode": pl.Buffered(1)} if single_buffer_weights else {}

    def wspec(r, c):
        return pl.BlockSpec((r, c), lambda b: (0, 0), **wkw)

    # Explicit VMEM budget: resident bf16 weights + f32 activations, with headroom.
    weight_bytes = 2 * (D * 3 * D + D * D + D * F + F * D) + 4 * (3 * D + 6 * D + F)
    act_bytes = 4 * (TB * S) * (6 * D + F) + 4 * TB * S * S * 2
    vmem_limit = int(min(96 * 2**20, max(32 * 2**20, 2 * weight_bytes + 4 * act_bytes)))

    return pl.pallas_call(
        kern,
        out_shape=jax.ShapeDtypeStruct((B, S, D), jnp.float32),
        grid_spec=pltpu.PrefetchScalarGridSpec(
            num_scalar_prefetch=0,
            grid=(B // TB,),
            in_specs=[
                pl.BlockSpec((TB, S, D), lambda b: (b, 0, 0)),   # src
                wspec(D, 3 * D), wspec(1, 3 * D),                # Wqkv, bqkv
                wspec(D, D), wspec(1, D),                        # Wo, bo
                wspec(1, D), wspec(1, D),                        # gamma1, beta1
                wspec(D, F), wspec(1, F),                        # W1, b1
                wspec(F, D), wspec(1, D),                        # W2, b2
                wspec(1, D), wspec(1, D),                        # gamma2, beta2
            ],
            out_specs=pl.BlockSpec((TB, S, D), lambda b: (b, 0, 0)),
        ),
        compiler_params=pltpu.CompilerParams(
            dimension_semantics=("parallel",),
            vmem_limit_bytes=vmem_limit,
        ),
    )


def transformer_encoder_layer(src: jax.Array, params: dict, *, nhead: int,
                              eps: float = 1e-6, block_b: int | None = None):
    """Fused TransformerEncoderLayer forward. Returns (output, comp_score=None)."""
    B, S, D = src.shape
    F = params["w1"].shape[1]
    assert D % nhead == 0, "d_model must be divisible by nhead"
    hd = D // nhead
    scale = 1.0 / math.sqrt(hd)

    TB = block_b if block_b is not None else _pick_block_b(B, S)
    assert B % TB == 0

    # Fuse the three QKV projections (scale folded into the Q part) and cast the
    # matmul weights to bf16; biases / LayerNorm affine parameters stay f32.
    wqkv = jnp.concatenate(
        [params["wq"] * scale, params["wk"], params["wv"]], axis=1
    ).astype(jnp.bfloat16)
    bqkv = jnp.concatenate(
        [params["bq"] * scale, params["bk"], params["bv"]], axis=1)
    args = (
        src, wqkv, bqkv,
        params["wo"].astype(jnp.bfloat16), params["bo"],
        params["g1"], params["beta1"],
        params["w1"].astype(jnp.bfloat16), params["bf1"],
        params["w2"].astype(jnp.bfloat16), params["bf2"],
        params["g2"], params["beta2"],
    )

    try:
        out = _make_call(B, S, D, F, TB, nhead, eps, True)(*args)
    except Exception:
        # Fallback for JAX builds that reject single-buffered weight BlockSpecs.
        out = _make_call(B, S, D, F, TB, nhead, eps, False)(*args)

    # num_modules == 1  ->  competition is None  ->  comp_score is None
    return out, None


# ----------------------------- parameter init --------------------------------
def init_params(key, d_model: int, d_ffn: int) -> dict:
    ks = jax.random.split(key, 12)
    a_attn = 1.0 / math.sqrt(d_model)
    a_f1 = 1.0 / math.sqrt(d_ffn)      # GroupLinear(din->d_ffn): a = 1/sqrt(dout)
    a_f2 = 1.0 / math.sqrt(d_model)    # GroupLinear(d_ffn->din): a = 1/sqrt(dout)
    u = lambda k, shape, a: jax.random.uniform(k, shape, jnp.float32, -a, a)
    return {
        "wq": u(ks[0], (d_model, d_model), a_attn),
        "wk": u(ks[1], (d_model, d_model), a_attn),
        "wv": u(ks[2], (d_model, d_model), a_attn),
        "bq": u(ks[3], (1, d_model), a_attn),
        "bk": u(ks[4], (1, d_model), a_attn),
        "bv": u(ks[5], (1, d_model), a_attn),
        "wo": u(ks[6], (d_model, d_model), a_attn),
        "bo": u(ks[7], (1, d_model), a_attn),
        "g1": jnp.ones((1, d_model), jnp.float32),
        "beta1": jnp.zeros((1, d_model), jnp.float32),
        "w1": u(ks[8], (d_model, d_ffn), a_f1),
        "bf1": u(ks[9], (1, d_ffn), a_f1),
        "w2": u(ks[10], (d_ffn, d_model), a_f2),
        "bf2": u(ks[11], (1, d_model), a_f2),
        "g2": jnp.ones((1, d_model), jnp.float32),
        "beta2": jnp.zeros((1, d_model), jnp.float32),
    }


# ------------------------------ pure-JAX reference ----------------------------
def _layer_norm_ref(x, g, b, eps):
    mu = jnp.mean(x, axis=-1, keepdims=True)
    var = jnp.mean((x - mu) ** 2, axis=-1, keepdims=True)
    return (x - mu) * jax.lax.rsqrt(var + eps) * g + b


def _reference(src, p, *, nhead: int, eps: float = 1e-6):
    hi = jax.lax.Precision.HIGHEST
    B, S, D = src.shape
    hd = D // nhead
    scale = 1.0 / math.sqrt(hd)

    q = jnp.matmul(src, p["wq"], precision=hi) + p["bq"]
    k = jnp.matmul(src, p["wk"], precision=hi) + p["bk"]
    v = jnp.matmul(src, p["wv"], precision=hi) + p["bv"]
    qh = q.reshape(B, S, nhead, hd).transpose(0, 2, 1, 3) * scale
    kh = k.reshape(B, S, nhead, hd).transpose(0, 2, 1, 3)
    vh = v.reshape(B, S, nhead, hd).transpose(0, 2, 1, 3)
    s = jnp.einsum("bhqd,bhkd->bhqk", qh, kh, precision=hi)
    pr = jax.nn.softmax(s, axis=-1)
    o = jnp.einsum("bhqk,bhkd->bhqd", pr, vh, precision=hi)
    o = o.transpose(0, 2, 1, 3).reshape(B, S, D)
    attn = jnp.matmul(o, p["wo"], precision=hi) + p["bo"]

    h1 = _layer_norm_ref(src + attn, p["g1"], p["beta1"], eps)
    f = jnp.maximum(jnp.matmul(h1, p["w1"], precision=hi) + p["bf1"], 0.0)
    f = jnp.matmul(f, p["w2"], precision=hi) + p["bf2"]
    return _layer_norm_ref(h1 + f, p["g2"], p["beta2"], eps)


if __name__ == "__main__":
    key = jax.random.PRNGKey(0)
    kx, kp = jax.random.split(key)

    batch, seq, d_model, d_ffn, nhead = 4, 8, 32, 64, 4
    src = jax.random.normal(kx, (batch, seq, d_model), dtype=jnp.float32)
    params = init_params(kp, d_model, d_ffn)

    out, comp_score = transformer_encoder_layer(src, params, nhead=nhead)
    out = jax.block_until_ready(out)

    assert out.shape == (batch, seq, d_model), out.shape
    assert comp_score is None

    ref = _reference(src, params, nhead=nhead)
    max_err = float(jnp.max(jnp.abs(out - ref)))
    # bf16 MXU matmuls (f32 accumulate) + approx-reciprocal softmax vs f32 HIGHEST ref.
    assert jnp.allclose(out, ref, atol=5e-2, rtol=5e-2), f"mismatch, max_err={max_err}"

    print("KERNEL_OK")
</pallas_src>

<mosaic_0001>
module attributes {stable_mosaic.version = 11 : i64} {
  func.func @_encoder_layer_kernel(%arg0: i32, %arg1: memref<2x8x32xf32, #tpu.memory_space<vmem>>, %arg2: memref<32x96xbf16, #tpu.memory_space<vmem>>, %arg3: memref<1x96xf32, #tpu.memory_space<vmem>>, %arg4: memref<32x32xbf16, #tpu.memory_space<vmem>>, %arg5: memref<1x32xf32, #tpu.memory_space<vmem>>, %arg6: memref<1x32xf32, #tpu.memory_space<vmem>>, %arg7: memref<1x32xf32, #tpu.memory_space<vmem>>, %arg8: memref<32x64xbf16, #tpu.memory_space<vmem>>, %arg9: memref<1x64xf32, #tpu.memory_space<vmem>>, %arg10: memref<64x32xbf16, #tpu.memory_space<vmem>>, %arg11: memref<1x32xf32, #tpu.memory_space<vmem>>, %arg12: memref<1x32xf32, #tpu.memory_space<vmem>>, %arg13: memref<1x32xf32, #tpu.memory_space<vmem>>, %arg14: memref<2x8x32xf32, #tpu.memory_space<vmem>>) attributes {dimension_semantics = [#tpu.dimension_semantics<parallel>], iteration_bounds = array<i64: 2>, scalar_prefetch = 0 : i64, scratch_operands = 0 : i64, tpu.core_type = #tpu.core_type<tc>, window_params = [{transform_indices = @transform_0, window_bounds = array<i64: 2, 8, 32>}, {pipeline_mode = #tpu.pipeline_mode<synchronous>, transform_indices = @transform_1, window_bounds = array<i64: 32, 96>}, {pipeline_mode = #tpu.pipeline_mode<synchronous>, transform_indices = @transform_2, window_bounds = array<i64: 1, 96>}, {pipeline_mode = #tpu.pipeline_mode<synchronous>, transform_indices = @transform_3, window_bounds = array<i64: 32, 32>}, {pipeline_mode = #tpu.pipeline_mode<synchronous>, transform_indices = @transform_4, window_bounds = array<i64: 1, 32>}, {pipeline_mode = #tpu.pipeline_mode<synchronous>, transform_indices = @transform_5, window_bounds = array<i64: 1, 32>}, {pipeline_mode = #tpu.pipeline_mode<synchronous>, transform_indices = @transform_6, window_bounds = array<i64: 1, 32>}, {pipeline_mode = #tpu.pipeline_mode<synchronous>, transform_indices = @transform_7, window_bounds = array<i64: 32, 64>}, {pipeline_mode = #tpu.pipeline_mode<synchronous>, transform_indices = @transform_8, window_bounds = array<i64: 1, 64>}, {pipeline_mode = #tpu.pipeline_mode<synchronous>, transform_indices = @transform_9, window_bounds = array<i64: 64, 32>}, {pipeline_mode = #tpu.pipeline_mode<synchronous>, transform_indices = @transform_10, window_bounds = array<i64: 1, 32>}, {pipeline_mode = #tpu.pipeline_mode<synchronous>, transform_indices = @transform_11, window_bounds = array<i64: 1, 32>}, {pipeline_mode = #tpu.pipeline_mode<synchronous>, transform_indices = @transform_12, window_bounds = array<i64: 1, 32>}, {transform_indices = @transform_13, window_bounds = array<i64: 2, 8, 32>}]} {
    %c0 = arith.constant 0 : index
    %c0_0 = arith.constant 0 : index
    %c0_1 = arith.constant 0 : index
    %0 = vector.load %arg1[%c0, %c0_0, %c0_1] : memref<2x8x32xf32, #tpu.memory_space<vmem>>, vector<2x8x32xf32>
    %1 = vector.shape_cast %0 : vector<2x8x32xf32> to vector<16x32xf32>
    %2 = arith.truncf %1 : vector<16x32xf32> to vector<16x32xbf16>
    %c0_2 = arith.constant 0 : index
    %c0_3 = arith.constant 0 : index
    %3 = vector.load %arg2[%c0_2, %c0_3] : memref<32x96xbf16, #tpu.memory_space<vmem>>, vector<32x96xbf16>
    %cst = arith.constant dense<0.000000e+00> : vector<16x96xf32>
    %4 = tpu.matmul %2, %3, %cst {dimension_numbers = #tpu.dot_dimension_numbers<[1], [0], [0], [1], [0, 0, 1, 1], [], []>} : vector<16x32xbf16>, vector<32x96xbf16>, vector<16x96xf32> -> vector<16x96xf32>
    %c0_4 = arith.constant 0 : index
    %c0_5 = arith.constant 0 : index
    %5 = vector.load %arg3[%c0_4, %c0_5] : memref<1x96xf32, #tpu.memory_space<vmem>>, vector<1x96xf32>
    %6 = vector.broadcast %5 : vector<1x96xf32> to vector<16x96xf32>
    %7 = arith.addf %4, %6 : vector<16x96xf32>
    %8 = vector.extract_strided_slice %7 {offsets = [0, 0], sizes = [16, 32], strides = [1, 1]} : vector<16x96xf32> to vector<16x32xf32>
    %9 = vector.shape_cast %8 : vector<16x32xf32> to vector<2x8x32xf32>
    %10 = arith.truncf %9 : vector<2x8x32xf32> to vector<2x8x32xbf16>
    %11 = vector.extract_strided_slice %7 {offsets = [0, 32], sizes = [16, 32], strides = [1, 1]} : vector<16x96xf32> to vector<16x32xf32>
    %12 = vector.shape_cast %11 : vector<16x32xf32> to vector<2x8x32xf32>
    %13 = arith.truncf %12 : vector<2x8x32xf32> to vector<2x8x32xbf16>
    %14 = vector.extract_strided_slice %7 {offsets = [0, 64], sizes = [16, 32], strides = [1, 1]} : vector<16x96xf32> to vector<16x32xf32>
    %15 = vector.shape_cast %14 : vector<16x32xf32> to vector<2x8x32xf32>
    %16 = arith.truncf %15 : vector<2x8x32xf32> to vector<2x8x32xbf16>
    %17 = vector.extract_strided_slice %10 {offsets = [0, 0, 0], sizes = [2, 8, 8], strides = [1, 1, 1]} : vector<2x8x32xbf16> to vector<2x8x8xbf16>
    %18 = vector.extract_strided_slice %13 {offsets = [0, 0, 0], sizes = [2, 8, 8], strides = [1, 1, 1]} : vector<2x8x32xbf16> to vector<2x8x8xbf16>
    %19 = vector.extract_strided_slice %16 {offsets = [0, 0, 0], sizes = [2, 8, 8], strides = [1, 1, 1]} : vector<2x8x32xbf16> to vector<2x8x8xbf16>
    "tpu.trace_start"() <{level = 10 : i32, message = "bqd,bkd->bqk"}> : () -> ()
    %cst_6 = arith.constant dense<0.000000e+00> : vector<2x8x8xf32>
    %20 = tpu.matmul %17, %18, %cst_6 {dimension_numbers = #tpu.dot_dimension_numbers<[2], [2], [1], [1], [0, 0, 0, 1, 1, 1], [0], [0]>} : vector<2x8x8xbf16>, vector<2x8x8xbf16>, vector<2x8x8xf32> -> vector<2x8x8xf32>
    "tpu.trace_stop"() : () -> ()
    %cst_7 = arith.constant dense<0xFF800000> : vector<2x8xf32>
    %21 = vector.multi_reduction <maximumf>, %20, %cst_7 [2] : vector<2x8x8xf32> to vector<2x8xf32>
    %22 = vector.shape_cast %21 : vector<2x8xf32> to vector<2x8x1xf32>
    %23 = vector.broadcast %22 : vector<2x8x1xf32> to vector<2x8x8xf32>
    %24 = arith.subf %20, %23 : vector<2x8x8xf32>
    %25 = math.exp %24 : vector<2x8x8xf32>
    %cst_8 = arith.constant dense<0.000000e+00> : vector<2x8xf32>
    %26 = vector.multi_reduction <add>, %25, %cst_8 [2] : vector<2x8x8xf32> to vector<2x8xf32>
    %27 = vector.shape_cast %26 : vector<2x8xf32> to vector<2x8x1xf32>
    %28 = tpu.reciprocal %27 {approx = true} : vector<2x8x1xf32> -> vector<2x8x1xf32>
    %29 = vector.broadcast %28 : vector<2x8x1xf32> to vector<2x8x8xf32>
    %30 = arith.mulf %25, %29 : vector<2x8x8xf32>
    %31 = arith.truncf %30 : vector<2x8x8xf32> to vector<2x8x8xbf16>
    "tpu.trace_start"() <{level = 10 : i32, message = "bqk,bkd->bqd"}> : () -> ()
    %cst_9 = arith.constant dense<0.000000e+00> : vector<2x8x8xf32>
    %32 = tpu.matmul %31, %19, %cst_9 {dimension_numbers = #tpu.dot_dimension_numbers<[2], [1], [1], [2], [0, 0, 0, 1, 1, 2], [0], [0]>} : vector<2x8x8xbf16>, vector<2x8x8xbf16>, vector<2x8x8xf32> -> vector<2x8x8xf32>
    "tpu.trace_stop"() : () -> ()
    %33 = vector.extract_strided_slice %10 {offsets = [0, 0, 8], sizes = [2, 8, 8], strides = [1, 1, 1]} : vector<2x8x32xbf16> to vector<2x8x8xbf16>
    %34 = vector.extract_strided_slice %13 {offsets = [0, 0, 8], sizes = [2, 8, 8], strides = [1, 1, 1]} : vector<2x8x32xbf16> to vector<2x8x8xbf16>
    %35 = vector.extract_strided_slice %16 {offsets = [0, 0, 8], sizes = [2, 8, 8], strides = [1, 1, 1]} : vector<2x8x32xbf16> to vector<2x8x8xbf16>
    "tpu.trace_start"() <{level = 10 : i32, message = "bqd,bkd->bqk"}> : () -> ()
    %cst_10 = arith.constant dense<0.000000e+00> : vector<2x8x8xf32>
    %36 = tpu.matmul %33, %34, %cst_10 {dimension_numbers = #tpu.dot_dimension_numbers<[2], [2], [1], [1], [0, 0, 0, 1, 1, 1], [0], [0]>} : vector<2x8x8xbf16>, vector<2x8x8xbf16>, vector<2x8x8xf32> -> vector<2x8x8xf32>
    "tpu.trace_stop"() : () -> ()
    %cst_11 = arith.constant dense<0xFF800000> : vector<2x8xf32>
    %37 = vector.multi_reduction <maximumf>, %36, %cst_11 [2] : vector<2x8x8xf32> to vector<2x8xf32>
    %38 = vector.shape_cast %37 : vector<2x8xf32> to vector<2x8x1xf32>
    %39 = vector.broadcast %38 : vector<2x8x1xf32> to vector<2x8x8xf32>
    %40 = arith.subf %36, %39 : vector<2x8x8xf32>
    %41 = math.exp %40 : vector<2x8x8xf32>
    %cst_12 = arith.constant dense<0.000000e+00> : vector<2x8xf32>
    %42 = vector.multi_reduction <add>, %41, %cst_12 [2] : vector<2x8x8xf32> to vector<2x8xf32>
    %43 = vector.shape_cast %42 : vector<2x8xf32> to vector<2x8x1xf32>
    %44 = tpu.reciprocal %43 {approx = true} : vector<2x8x1xf32> -> vector<2x8x1xf32>
    %45 = vector.broadcast %44 : vector<2x8x1xf32> to vector<2x8x8xf32>
    %46 = arith.mulf %41, %45 : vector<2x8x8xf32>
    %47 = arith.truncf %46 : vector<2x8x8xf32> to vector<2x8x8xbf16>
    "tpu.trace_start"() <{level = 10 : i32, message = "bqk,bkd->bqd"}> : () -> ()
    %cst_13 = arith.constant dense<0.000000e+00> : vector<2x8x8xf32>
    %48 = tpu.matmul %47, %35, %cst_13 {dimension_numbers = #tpu.dot_dimension_numbers<[2], [1], [1], [2], [0, 0, 0, 1, 1, 2], [0], [0]>} : vector<2x8x8xbf16>, vector<2x8x8xbf16>, vector<2x8x8xf32> -> vector<2x8x8xf32>
    "tpu.trace_stop"() : () -> ()
    %49 = vector.extract_strided_slice %10 {offsets = [0, 0, 16], sizes = [2, 8, 8], strides = [1, 1, 1]} : vector<2x8x32xbf16> to vector<2x8x8xbf16>
    %50 = vector.extract_strided_slice %13 {offsets = [0, 0, 16], sizes = [2, 8, 8], strides = [1, 1, 1]} : vector<2x8x32xbf16> to vector<2x8x8xbf16>
    %51 = vector.extract_strided_slice %16 {offsets = [0, 0, 16], sizes = [2, 8, 8], strides = [1, 1, 1]} : vector<2x8x32xbf16> to vector<2x8x8xbf16>
    "tpu.trace_start"() <{level = 10 : i32, message = "bqd,bkd->bqk"}> : () -> ()
    %cst_14 = arith.constant dense<0.000000e+00> : vector<2x8x8xf32>
    %52 = tpu.matmul %49, %50, %cst_14 {dimension_numbers = #tpu.dot_dimension_numbers<[2], [2], [1], [1], [0, 0, 0, 1, 1, 1], [0], [0]>} : vector<2x8x8xbf16>, vector<2x8x8xbf16>, vector<2x8x8xf32> -> vector<2x8x8xf32>
    "tpu.trace_stop"() : () -> ()
    %cst_15 = arith.constant dense<0xFF800000> : vector<2x8xf32>
    %53 = vector.multi_reduction <maximumf>, %52, %cst_15 [2] : vector<2x8x8xf32> to vector<2x8xf32>
    %54 = vector.shape_cast %53 : vector<2x8xf32> to vector<2x8x1xf32>
    %55 = vector.broadcast %54 : vector<2x8x1xf32> to vector<2x8x8xf32>
    %56 = arith.subf %52, %55 : vector<2x8x8xf32>
    %57 = math.exp %56 : vector<2x8x8xf32>
    %cst_16 = arith.constant dense<0.000000e+00> : vector<2x8xf32>
    %58 = vector.multi_reduction <add>, %57, %cst_16 [2] : vector<2x8x8xf32> to vector<2x8xf32>
    %59 = vector.shape_cast %58 : vector<2x8xf32> to vector<2x8x1xf32>
    %60 = tpu.reciprocal %59 {approx = true} : vector<2x8x1xf32> -> vector<2x8x1xf32>
    %61 = vector.broadcast %60 : vector<2x8x1xf32> to vector<2x8x8xf32>
    %62 = arith.mulf %57, %61 : vector<2x8x8xf32>
    %63 = arith.truncf %62 : vector<2x8x8xf32> to vector<2x8x8xbf16>
    "tpu.trace_start"() <{level = 10 : i32, message = "bqk,bkd->bqd"}> : () -> ()
    %cst_17 = arith.constant dense<0.000000e+00> : vector<2x8x8xf32>
    %64 = tpu.matmul %63, %51, %cst_17 {dimension_numbers = #tpu.dot_dimension_numbers<[2], [1], [1], [2], [0, 0, 0, 1, 1, 2], [0], [0]>} : vector<2x8x8xbf16>, vector<2x8x8xbf16>, vector<2x8x8xf32> -> vector<2x8x8xf32>
    "tpu.trace_stop"() : () -> ()
    %65 = vector.extract_strided_slice %10 {offsets = [0, 0, 24], sizes = [2, 8, 8], strides = [1, 1, 1]} : vector<2x8x32xbf16> to vector<2x8x8xbf16>
    %66 = vector.extract_strided_slice %13 {offsets = [0, 0, 24], sizes = [2, 8, 8], strides = [1, 1, 1]} : vector<2x8x32xbf16> to vector<2x8x8xbf16>
    %67 = vector.extract_strided_slice %16 {offsets = [0, 0, 24], sizes = [2, 8, 8], strides = [1, 1, 1]} : vector<2x8x32xbf16> to vector<2x8x8xbf16>
    "tpu.trace_start"() <{level = 10 : i32, message = "bqd,bkd->bqk"}> : () -> ()
    %cst_18 = arith.constant dense<0.000000e+00> : vector<2x8x8xf32>
    %68 = tpu.matmul %65, %66, %cst_18 {dimension_numbers = #tpu.dot_dimension_numbers<[2], [2], [1], [1], [0, 0, 0, 1, 1, 1], [0], [0]>} : vector<2x8x8xbf16>, vector<2x8x8xbf16>, vector<2x8x8xf32> -> vector<2x8x8xf32>
    "tpu.trace_stop"() : () -> ()
    %cst_19 = arith.constant dense<0xFF800000> : vector<2x8xf32>
    %69 = vector.multi_reduction <maximumf>, %68, %cst_19 [2] : vector<2x8x8xf32> to vector<2x8xf32>
    %70 = vector.shape_cast %69 : vector<2x8xf32> to vector<2x8x1xf32>
    %71 = vector.broadcast %70 : vector<2x8x1xf32> to vector<2x8x8xf32>
    %72 = arith.subf %68, %71 : vector<2x8x8xf32>
    %73 = math.exp %72 : vector<2x8x8xf32>
    %cst_20 = arith.constant dense<0.000000e+00> : vector<2x8xf32>
    %74 = vector.multi_reduction <add>, %73, %cst_20 [2] : vector<2x8x8xf32> to vector<2x8xf32>
    %75 = vector.shape_cast %74 : vector<2x8xf32> to vector<2x8x1xf32>
    %76 = tpu.reciprocal %75 {approx = true} : vector<2x8x1xf32> -> vector<2x8x1xf32>
    %77 = vector.broadcast %76 : vector<2x8x1xf32> to vector<2x8x8xf32>
    %78 = arith.mulf %73, %77 : vector<2x8x8xf32>
    %79 = arith.truncf %78 : vector<2x8x8xf32> to vector<2x8x8xbf16>
    "tpu.trace_start"() <{level = 10 : i32, message = "bqk,bkd->bqd"}> : () -> ()
    %cst_21 = arith.constant dense<0.000000e+00> : vector<2x8x8xf32>
    %80 = tpu.matmul %79, %67, %cst_21 {dimension_numbers = #tpu.dot_dimension_numbers<[2], [1], [1], [2], [0, 0, 0, 1, 1, 2], [0], [0]>} : vector<2x8x8xbf16>, vector<2x8x8xbf16>, vector<2x8x8xf32> -> vector<2x8x8xf32>
    "tpu.trace_stop"() : () -> ()
    %81 = tpu.concatenate %32, %48, %64, %80 in 2 : vector<2x8x8xf32>, vector<2x8x8xf32>, vector<2x8x8xf32>, vector<2x8x8xf32> -> vector<2x8x32xf32>
    %82 = vector.shape_cast %81 : vector<2x8x32xf32> to vector<16x32xf32>
    %83 = arith.truncf %82 : vector<16x32xf32> to vector<16x32xbf16>
    %c0_22 = arith.constant 0 : index
    %c0_23 = arith.constant 0 : index
    %84 = vector.load %arg4[%c0_22, %c0_23] : memref<32x32xbf16, #tpu.memory_space<vmem>>, vector<32x32xbf16>
    %cst_24 = arith.constant dense<0.000000e+00> : vector<16x32xf32>
    %85 = tpu.matmul %83, %84, %cst_24 {dimension_numbers = #tpu.dot_dimension_numbers<[1], [0], [0], [1], [0, 0, 1, 1], [], []>} : vector<16x32xbf16>, vector<32x32xbf16>, vector<16x32xf32> -> vector<16x32xf32>
    %c0_25 = arith.constant 0 : index
    %c0_26 = arith.constant 0 : index
    %86 = vector.load %arg5[%c0_25, %c0_26] : memref<1x32xf32, #tpu.memory_space<vmem>>, vector<1x32xf32>
    %87 = vector.broadcast %86 : vector<1x32xf32> to vector<16x32xf32>
    %88 = arith.addf %85, %87 : vector<16x32xf32>
    %89 = arith.addf %1, %88 : vector<16x32xf32>
    %cst_27 = arith.constant dense<0.000000e+00> : vector<16xf32>
    %90 = vector.multi_reduction <add>, %89, %cst_27 [1] : vector<16x32xf32> to vector<16xf32>
    %91 = vector.shape_cast %90 : vector<16xf32> to vector<16x1xf32>
    %cst_28 = arith.constant 3.200000e+01 : f32
    %92 = vector.broadcast %cst_28 : f32 to vector<16x1xf32>
    %93 = arith.divf %91, %92 : vector<16x1xf32>
    %94 = vector.broadcast %93 : vector<16x1xf32> to vector<16x32xf32>
    %95 = arith.subf %89, %94 : vector<16x32xf32>
    %96 = arith.mulf %95, %95 : vector<16x32xf32>
    %cst_29 = arith.constant dense<0.000000e+00> : vector<16xf32>
    %97 = vector.multi_reduction <add>, %96, %cst_29 [1] : vector<16x32xf32> to vector<16xf32>
    %98 = vector.shape_cast %97 : vector<16xf32> to vector<16x1xf32>
    %cst_30 = arith.constant 3.200000e+01 : f32
    %99 = vector.broadcast %cst_30 : f32 to vector<16x1xf32>
    %100 = arith.divf %98, %99 : vector<16x1xf32>
    %101 = vector.broadcast %93 : vector<16x1xf32> to vector<16x32xf32>
    %102 = arith.subf %89, %101 : vector<16x32xf32>
    %cst_31 = arith.constant 9.99999997E-7 : f32
    %103 = vector.broadcast %cst_31 : f32 to vector<16x1xf32>
    %104 = arith.addf %100, %103 : vector<16x1xf32>
    %105 = math.rsqrt %104 : vector<16x1xf32>
    %106 = vector.broadcast %105 : vector<16x1xf32> to vector<16x32xf32>
    %107 = arith.mulf %102, %106 : vector<16x32xf32>
    %c0_32 = arith.constant 0 : index
    %c0_33 = arith.constant 0 : index
    %108 = vector.load %arg6[%c0_32, %c0_33] : memref<1x32xf32, #tpu.memory_space<vmem>>, vector<1x32xf32>
    %109 = vector.broadcast %108 : vector<1x32xf32> to vector<16x32xf32>
    %110 = arith.mulf %107, %109 : vector<16x32xf32>
    %c0_34 = arith.constant 0 : index
    %c0_35 = arith.constant 0 : index
    %111 = vector.load %arg7[%c0_34, %c0_35] : memref<1x32xf32, #tpu.memory_space<vmem>>, vector<1x32xf32>
    %112 = vector.broadcast %111 : vector<1x32xf32> to vector<16x32xf32>
    %113 = arith.addf %110, %112 : vector<16x32xf32>
    %114 = arith.truncf %113 : vector<16x32xf32> to vector<16x32xbf16>
    %c0_36 = arith.constant 0 : index
    %c0_37 = arith.constant 0 : index
    %115 = vector.load %arg8[%c0_36, %c0_37] : memref<32x64xbf16, #tpu.memory_space<vmem>>, vector<32x64xbf16>
    %cst_38 = arith.constant dense<0.000000e+00> : vector<16x64xf32>
    %116 = tpu.matmul %114, %115, %cst_38 {dimension_numbers = #tpu.dot_dimension_numbers<[1], [0], [0], [1], [0, 0, 1, 1], [], []>} : vector<16x32xbf16>, vector<32x64xbf16>, vector<16x64xf32> -> vector<16x64xf32>
    %c0_39 = arith.constant 0 : index
    %c0_40 = arith.constant 0 : index
    %117 = vector.load %arg9[%c0_39, %c0_40] : memref<1x64xf32, #tpu.memory_space<vmem>>, vector<1x64xf32>
    %118 = vector.broadcast %117 : vector<1x64xf32> to vector<16x64xf32>
    %119 = arith.addf %116, %118 : vector<16x64xf32>
    %cst_41 = arith.constant 0.000000e+00 : f32
    %120 = vector.broadcast %cst_41 : f32 to vector<16x64xf32>
    %121 = arith.maximumf %119, %120 : vector<16x64xf32>
    %122 = arith.truncf %121 : vector<16x64xf32> to vector<16x64xbf16>
    %c0_42 = arith.constant 0 : index
    %c0_43 = arith.constant 0 : index
    %123 = vector.load %arg10[%c0_42, %c0_43] : memref<64x32xbf16, #tpu.memory_space<vmem>>, vector<64x32xbf16>
    %cst_44 = arith.constant dense<0.000000e+00> : vector<16x32xf32>
    %124 = tpu.matmul %122, %123, %cst_44 {dimension_numbers = #tpu.dot_dimension_numbers<[1], [0], [0], [1], [0, 0, 1, 1], [], []>} : vector<16x64xbf16>, vector<64x32xbf16>, vector<16x32xf32> -> vector<16x32xf32>
    %c0_45 = arith.constant 0 : index
    %c0_46 = arith.constant 0 : index
    %125 = vector.load %arg11[%c0_45, %c0_46] : memref<1x32xf32, #tpu.memory_space<vmem>>, vector<1x32xf32>
    %126 = vector.broadcast %125 : vector<1x32xf32> to vector<16x32xf32>
    %127 = arith.addf %124, %126 : vector<16x32xf32>
    %128 = arith.addf %113, %127 : vector<16x32xf32>
    %cst_47 = arith.constant dense<0.000000e+00> : vector<16xf32>
    %129 = vector.multi_reduction <add>, %128, %cst_47 [1] : vector<16x32xf32> to vector<16xf32>
    %130 = vector.shape_cast %129 : vector<16xf32> to vector<16x1xf32>
    %cst_48 = arith.constant 3.200000e+01 : f32
    %131 = vector.broadcast %cst_48 : f32 to vector<16x1xf32>
    %132 = arith.divf %130, %131 : vector<16x1xf32>
    %133 = vector.broadcast %132 : vector<16x1xf32> to vector<16x32xf32>
    %134 = arith.subf %128, %133 : vector<16x32xf32>
    %135 = arith.mulf %134, %134 : vector<16x32xf32>
    %cst_49 = arith.constant dense<0.000000e+00> : vector<16xf32>
    %136 = vector.multi_reduction <add>, %135, %cst_49 [1] : vector<16x32xf32> to vector<16xf32>
    %137 = vector.shape_cast %136 : vector<16xf32> to vector<16x1xf32>
    %cst_50 = arith.constant 3.200000e+01 : f32
    %138 = vector.broadcast %cst_50 : f32 to vector<16x1xf32>
    %139 = arith.divf %137, %138 : vector<16x1xf32>
    %140 = vector.broadcast %132 : vector<16x1xf32> to vector<16x32xf32>
    %141 = arith.subf %128, %140 : vector<16x32xf32>
    %cst_51 = arith.constant 9.99999997E-7 : f32
    %142 = vector.broadcast %cst_51 : f32 to vector<16x1xf32>
    %143 = arith.addf %139, %142 : vector<16x1xf32>
    %144 = math.rsqrt %143 : vector<16x1xf32>
    %145 = vector.broadcast %144 : vector<16x1xf32> to vector<16x32xf32>
    %146 = arith.mulf %141, %145 : vector<16x32xf32>
    %c0_52 = arith.constant 0 : index
    %c0_53 = arith.constant 0 : index
    %147 = vector.load %arg12[%c0_52, %c0_53] : memref<1x32xf32, #tpu.memory_space<vmem>>, vector<1x32xf32>
    %148 = vector.broadcast %147 : vector<1x32xf32> to vector<16x32xf32>
    %149 = arith.mulf %146, %148 : vector<16x32xf32>
    %c0_54 = arith.constant 0 : index
    %c0_55 = arith.constant 0 : index
    %150 = vector.load %arg13[%c0_54, %c0_55] : memref<1x32xf32, #tpu.memory_space<vmem>>, vector<1x32xf32>
    %151 = vector.broadcast %150 : vector<1x32xf32> to vector<16x32xf32>
    %152 = arith.addf %149, %151 : vector<16x32xf32>
    %153 = vector.shape_cast %152 : vector<16x32xf32> to vector<2x8x32xf32>
    %c0_56 = arith.constant 0 : index
    %c0_57 = arith.constant 0 : index
    %c0_58 = arith.constant 0 : index
    %154 = vector.load %arg14[%c0_56, %c0_57, %c0_58] : memref<2x8x32xf32, #tpu.memory_space<vmem>>, vector<2x8x32xf32>
    tpu.vector_store %arg14[%c0_56, %c0_57, %c0_58], %153 {strides = array<i32>} : memref<2x8x32xf32, #tpu.memory_space<vmem>>, vector<2x8x32xf32>,
    return
  }
  func.func @transform_0(%arg0: i32) -> (i32, i32, i32) {
    %c0_i32 = arith.constant 0 : i32
    %c0_i32_0 = arith.constant 0 : i32
    %c0_i32_1 = arith.constant 0 : i32
    return %arg0, %c0_i32, %c0_i32_0 : i32, i32, i32
  }
  func.func @transform_1(%arg0: i32) -> (i32, i32) {
    %c0_i32 = arith.constant 0 : i32
    %c0_i32_0 = arith.constant 0 : i32
    %c0_i32_1 = arith.constant 0 : i32
    return %c0_i32, %c0_i32_0 : i32, i32
  }
  func.func @transform_2(%arg0: i32) -> (i32, i32) {
    %c0_i32 = arith.constant 0 : i32
    %c0_i32_0 = arith.constant 0 : i32
    %c0_i32_1 = arith.constant 0 : i32
    return %c0_i32, %c0_i32_0 : i32, i32
  }
  func.func @transform_3(%arg0: i32) -> (i32, i32) {
    %c0_i32 = arith.constant 0 : i32
    %c0_i32_0 = arith.constant 0 : i32
    %c0_i32_1 = arith.constant 0 : i32
    return %c0_i32, %c0_i32_0 : i32, i32
  }
  func.func @transform_4(%arg0: i32) -> (i32, i32) {
    %c0_i32 = arith.constant 0 : i32
    %c0_i32_0 = arith.constant 0 : i32
    %c0_i32_1 = arith.constant 0 : i32
    return %c0_i32, %c0_i32_0 : i32, i32
  }
  func.func @transform_5(%arg0: i32) -> (i32, i32) {
    %c0_i32 = arith.constant 0 : i32
    %c0_i32_0 = arith.constant 0 : i32
    %c0_i32_1 = arith.constant 0 : i32
    return %c0_i32, %c0_i32_0 : i32, i32
  }
  func.func @transform_6(%arg0: i32) -> (i32, i32) {
    %c0_i32 = arith.constant 0 : i32
    %c0_i32_0 = arith.constant 0 : i32
    %c0_i32_1 = arith.constant 0 : i32
    return %c0_i32, %c0_i32_0 : i32, i32
  }
  func.func @transform_7(%arg0: i32) -> (i32, i32) {
    %c0_i32 = arith.constant 0 : i32
    %c0_i32_0 = arith.constant 0 : i32
    %c0_i32_1 = arith.constant 0 : i32
    return %c0_i32, %c0_i32_0 : i32, i32
  }
  func.func @transform_8(%arg0: i32) -> (i32, i32) {
    %c0_i32 = arith.constant 0 : i32
    %c0_i32_0 = arith.constant 0 : i32
    %c0_i32_1 = arith.constant 0 : i32
    return %c0_i32, %c0_i32_0 : i32, i32
  }
  func.func @transform_9(%arg0: i32) -> (i32, i32) {
    %c0_i32 = arith.constant 0 : i32
    %c0_i32_0 = arith.constant 0 : i32
    %c0_i32_1 = arith.constant 0 : i32
    return %c0_i32, %c0_i32_0 : i32, i32
  }
  func.func @transform_10(%arg0: i32) -> (i32, i32) {
    %c0_i32 = arith.constant 0 : i32
    %c0_i32_0 = arith.constant 0 : i32
    %c0_i32_1 = arith.constant 0 : i32
    return %c0_i32, %c0_i32_0 : i32, i32
  }
  func.func @transform_11(%arg0: i32) -> (i32, i32) {
    %c0_i32 = arith.constant 0 : i32
    %c0_i32_0 = arith.constant 0 : i32
    %c0_i32_1 = arith.constant 0 : i32
    return %c0_i32, %c0_i32_0 : i32, i32
  }
  func.func @transform_12(%arg0: i32) -> (i32, i32) {
    %c0_i32 = arith.constant 0 : i32
    %c0_i32_0 = arith.constant 0 : i32
    %c0_i32_1 = arith.constant 0 : i32
    return %c0_i32, %c0_i32_0 : i32, i32
  }
  func.func @transform_13(%arg0: i32) -> (i32, i32, i32) {
    %c0_i32 = arith.constant 0 : i32
    %c0_i32_0 = arith.constant 0 : i32
    %c0_i32_1 = arith.constant 0 : i32
    return %arg0, %c0_i32, %c0_i32_0 : i32, i32, i32
  }
}

module attributes {stable_mosaic.version = 11 : i64} {
  func.func @_encoder_layer_kernel(%arg0: i32, %arg1: memref<2x8x32xf32, #tpu.memory_space<vmem>>, %arg2: memref<32x96xbf16, #tpu.memory_space<vmem>>, %arg3: memref<1x96xf32, #tpu.memory_space<vmem>>, %arg4: memref<32x32xbf16, #tpu.memory_space<vmem>>, %arg5: memref<1x32xf32, #tpu.memory_space<vmem>>, %arg6: memref<1x32xf32, #tpu.memory_space<vmem>>, %arg7: memref<1x32xf32, #tpu.memory_space<vmem>>, %arg8: memref<32x64xbf16, #tpu.memory_space<vmem>>, %arg9: memref<1x64xf32, #tpu.memory_space<vmem>>, %arg10: memref<64x32xbf16, #tpu.memory_space<vmem>>, %arg11: memref<1x32xf32, #tpu.memory_space<vmem>>, %arg12: memref<1x32xf32, #tpu.memory_space<vmem>>, %arg13: memref<1x32xf32, #tpu.memory_space<vmem>>, %arg14: memref<2x8x32xf32, #tpu.memory_space<vmem>>) attributes {dimension_semantics = [#tpu.dimension_semantics<parallel>], iteration_bounds = array<i64: 2>, scalar_prefetch = 0 : i64, scratch_operands = 0 : i64, tpu.core_type = #tpu.core_type<tc>, window_params = [{transform_indices = @transform_0, window_bounds = array<i64: 2, 8, 32>}, {pipeline_mode = #tpu.pipeline_mode<synchronous>, transform_indices = @transform_1, window_bounds = array<i64: 32, 96>}, {pipeline_mode = #tpu.pipeline_mode<synchronous>, transform_indices = @transform_2, window_bounds = array<i64: 1, 96>}, {pipeline_mode = #tpu.pipeline_mode<synchronous>, transform_indices = @transform_3, window_bounds = array<i64: 32, 32>}, {pipeline_mode = #tpu.pipeline_mode<synchronous>, transform_indices = @transform_4, window_bounds = array<i64: 1, 32>}, {pipeline_mode = #tpu.pipeline_mode<synchronous>, transform_indices = @transform_5, window_bounds = array<i64: 1, 32>}, {pipeline_mode = #tpu.pipeline_mode<synchronous>, transform_indices = @transform_6, window_bounds = array<i64: 1, 32>}, {pipeline_mode = #tpu.pipeline_mode<synchronous>, transform_indices = @transform_7, window_bounds = array<i64: 32, 64>}, {pipeline_mode = #tpu.pipeline_mode<synchronous>, transform_indices = @transform_8, window_bounds = array<i64: 1, 64>}, {pipeline_mode = #tpu.pipeline_mode<synchronous>, transform_indices = @transform_9, window_bounds = array<i64: 64, 32>}, {pipeline_mode = #tpu.pipeline_mode<synchronous>, transform_indices = @transform_10, window_bounds = array<i64: 1, 32>}, {pipeline_mode = #tpu.pipeline_mode<synchronous>, transform_indices = @transform_11, window_bounds = array<i64: 1, 32>}, {pipeline_mode = #tpu.pipeline_mode<synchronous>, transform_indices = @transform_12, window_bounds = array<i64: 1, 32>}, {transform_indices = @transform_13, window_bounds = array<i64: 2, 8, 32>}]} {
    %c0 = arith.constant 0 : index
    %c0_0 = arith.constant 0 : index
    %c0_1 = arith.constant 0 : index
    %0 = vector.load %arg1[%c0, %c0_0, %c0_1] : memref<2x8x32xf32, #tpu.memory_space<vmem>>, vector<2x8x32xf32>
    %1 = vector.shape_cast %0 : vector<2x8x32xf32> to vector<16x32xf32>
    %2 = arith.truncf %1 : vector<16x32xf32> to vector<16x32xbf16>
    %c0_2 = arith.constant 0 : index
    %c0_3 = arith.constant 0 : index
    %3 = vector.load %arg2[%c0_2, %c0_3] : memref<32x96xbf16, #tpu.memory_space<vmem>>, vector<32x96xbf16>
    %cst = arith.constant dense<0.000000e+00> : vector<16x96xf32>
    %4 = tpu.matmul %2, %3, %cst {dimension_numbers = #tpu.dot_dimension_numbers<[1], [0], [0], [1], [0, 0, 1, 1], [], []>} : vector<16x32xbf16>, vector<32x96xbf16>, vector<16x96xf32> -> vector<16x96xf32>
    %c0_4 = arith.constant 0 : index
    %c0_5 = arith.constant 0 : index
    %5 = vector.load %arg3[%c0_4, %c0_5] : memref<1x96xf32, #tpu.memory_space<vmem>>, vector<1x96xf32>
    %6 = vector.broadcast %5 : vector<1x96xf32> to vector<16x96xf32>
    %7 = arith.addf %4, %6 : vector<16x96xf32>
    %8 = vector.extract_strided_slice %7 {offsets = [0, 0], sizes = [16, 32], strides = [1, 1]} : vector<16x96xf32> to vector<16x32xf32>
    %9 = vector.shape_cast %8 : vector<16x32xf32> to vector<2x8x32xf32>
    %10 = arith.truncf %9 : vector<2x8x32xf32> to vector<2x8x32xbf16>
    %11 = vector.extract_strided_slice %7 {offsets = [0, 32], sizes = [16, 32], strides = [1, 1]} : vector<16x96xf32> to vector<16x32xf32>
    %12 = vector.shape_cast %11 : vector<16x32xf32> to vector<2x8x32xf32>
    %13 = arith.truncf %12 : vector<2x8x32xf32> to vector<2x8x32xbf16>
    %14 = vector.extract_strided_slice %7 {offsets = [0, 64], sizes = [16, 32], strides = [1, 1]} : vector<16x96xf32> to vector<16x32xf32>
    %15 = vector.shape_cast %14 : vector<16x32xf32> to vector<2x8x32xf32>
    %16 = arith.truncf %15 : vector<2x8x32xf32> to vector<2x8x32xbf16>
    %17 = vector.extract_strided_slice %10 {offsets = [0, 0, 0], sizes = [2, 8, 8], strides = [1, 1, 1]} : vector<2x8x32xbf16> to vector<2x8x8xbf16>
    %18 = vector.extract_strided_slice %13 {offsets = [0, 0, 0], sizes = [2, 8, 8], strides = [1, 1, 1]} : vector<2x8x32xbf16> to vector<2x8x8xbf16>
    %19 = vector.extract_strided_slice %16 {offsets = [0, 0, 0], sizes = [2, 8, 8], strides = [1, 1, 1]} : vector<2x8x32xbf16> to vector<2x8x8xbf16>
    "tpu.trace_start"() <{level = 10 : i32, message = "bqd,bkd->bqk"}> : () -> ()
    %cst_6 = arith.constant dense<0.000000e+00> : vector<2x8x8xf32>
    %20 = tpu.matmul %17, %18, %cst_6 {dimension_numbers = #tpu.dot_dimension_numbers<[2], [2], [1], [1], [0, 0, 0, 1, 1, 1], [0], [0]>} : vector<2x8x8xbf16>, vector<2x8x8xbf16>, vector<2x8x8xf32> -> vector<2x8x8xf32>
    "tpu.trace_stop"() : () -> ()
    %cst_7 = arith.constant dense<0xFF800000> : vector<2x8xf32>
    %21 = vector.multi_reduction <maximumf>, %20, %cst_7 [2] : vector<2x8x8xf32> to vector<2x8xf32>
    %22 = vector.shape_cast %21 : vector<2x8xf32> to vector<2x8x1xf32>
    %23 = vector.broadcast %22 : vector<2x8x1xf32> to vector<2x8x8xf32>
    %24 = arith.subf %20, %23 : vector<2x8x8xf32>
    %25 = math.exp %24 : vector<2x8x8xf32>
    %cst_8 = arith.constant dense<0.000000e+00> : vector<2x8xf32>
    %26 = vector.multi_reduction <add>, %25, %cst_8 [2] : vector<2x8x8xf32> to vector<2x8xf32>
    %27 = vector.shape_cast %26 : vector<2x8xf32> to vector<2x8x1xf32>
    %28 = tpu.reciprocal %27 {approx = true} : vector<2x8x1xf32> -> vector<2x8x1xf32>
    %29 = vector.broadcast %28 : vector<2x8x1xf32> to vector<2x8x8xf32>
    %30 = arith.mulf %25, %29 : vector<2x8x8xf32>
    %31 = arith.truncf %30 : vector<2x8x8xf32> to vector<2x8x8xbf16>
    "tpu.trace_start"() <{level = 10 : i32, message = "bqk,bkd->bqd"}> : () -> ()
    %cst_9 = arith.constant dense<0.000000e+00> : vector<2x8x8xf32>
    %32 = tpu.matmul %31, %19, %cst_9 {dimension_numbers = #tpu.dot_dimension_numbers<[2], [1], [1], [2], [0, 0, 0, 1, 1, 2], [0], [0]>} : vector<2x8x8xbf16>, vector<2x8x8xbf16>, vector<2x8x8xf32> -> vector<2x8x8xf32>
    "tpu.trace_stop"() : () -> ()
    %33 = vector.extract_strided_slice %10 {offsets = [0, 0, 8], sizes = [2, 8, 8], strides = [1, 1, 1]} : vector<2x8x32xbf16> to vector<2x8x8xbf16>
    %34 = vector.extract_strided_slice %13 {offsets = [0, 0, 8], sizes = [2, 8, 8], strides = [1, 1, 1]} : vector<2x8x32xbf16> to vector<2x8x8xbf16>
    %35 = vector.extract_strided_slice %16 {offsets = [0, 0, 8], sizes = [2, 8, 8], strides = [1, 1, 1]} : vector<2x8x32xbf16> to vector<2x8x8xbf16>
    "tpu.trace_start"() <{level = 10 : i32, message = "bqd,bkd->bqk"}> : () -> ()
    %cst_10 = arith.constant dense<0.000000e+00> : vector<2x8x8xf32>
    %36 = tpu.matmul %33, %34, %cst_10 {dimension_numbers = #tpu.dot_dimension_numbers<[2], [2], [1], [1], [0, 0, 0, 1, 1, 1], [0], [0]>} : vector<2x8x8xbf16>, vector<2x8x8xbf16>, vector<2x8x8xf32> -> vector<2x8x8xf32>
    "tpu.trace_stop"() : () -> ()
    %cst_11 = arith.constant dense<0xFF800000> : vector<2x8xf32>
    %37 = vector.multi_reduction <maximumf>, %36, %cst_11 [2] : vector<2x8x8xf32> to vector<2x8xf32>
    %38 = vector.shape_cast %37 : vector<2x8xf32> to vector<2x8x1xf32>
    %39 = vector.broadcast %38 : vector<2x8x1xf32> to vector<2x8x8xf32>
    %40 = arith.subf %36, %39 : vector<2x8x8xf32>
    %41 = math.exp %40 : vector<2x8x8xf32>
    %cst_12 = arith.constant dense<0.000000e+00> : vector<2x8xf32>
    %42 = vector.multi_reduction <add>, %41, %cst_12 [2] : vector<2x8x8xf32> to vector<2x8xf32>
    %43 = vector.shape_cast %42 : vector<2x8xf32> to vector<2x8x1xf32>
    %44 = tpu.reciprocal %43 {approx = true} : vector<2x8x1xf32> -> vector<2x8x1xf32>
    %45 = vector.broadcast %44 : vector<2x8x1xf32> to vector<2x8x8xf32>
    %46 = arith.mulf %41, %45 : vector<2x8x8xf32>
    %47 = arith.truncf %46 : vector<2x8x8xf32> to vector<2x8x8xbf16>
    "tpu.trace_start"() <{level = 10 : i32, message = "bqk,bkd->bqd"}> : () -> ()
    %cst_13 = arith.constant dense<0.000000e+00> : vector<2x8x8xf32>
    %48 = tpu.matmul %47, %35, %cst_13 {dimension_numbers = #tpu.dot_dimension_numbers<[2], [1], [1], [2], [0, 0, 0, 1, 1, 2], [0], [0]>} : vector<2x8x8xbf16>, vector<2x8x8xbf16>, vector<2x8x8xf32> -> vector<2x8x8xf32>
    "tpu.trace_stop"() : () -> ()
    %49 = vector.extract_strided_slice %10 {offsets = [0, 0, 16], sizes = [2, 8, 8], strides = [1, 1, 1]} : vector<2x8x32xbf16> to vector<2x8x8xbf16>
    %50 = vector.extract_strided_slice %13 {offsets = [0, 0, 16], sizes = [2, 8, 8], strides = [1, 1, 1]} : vector<2x8x32xbf16> to vector<2x8x8xbf16>
    %51 = vector.extract_strided_slice %16 {offsets = [0, 0, 16], sizes = [2, 8, 8], strides = [1, 1, 1]} : vector<2x8x32xbf16> to vector<2x8x8xbf16>
    "tpu.trace_start"() <{level = 10 : i32, message = "bqd,bkd->bqk"}> : () -> ()
    %cst_14 = arith.constant dense<0.000000e+00> : vector<2x8x8xf32>
    %52 = tpu.matmul %49, %50, %cst_14 {dimension_numbers = #tpu.dot_dimension_numbers<[2], [2], [1], [1], [0, 0, 0, 1, 1, 1], [0], [0]>} : vector<2x8x8xbf16>, vector<2x8x8xbf16>, vector<2x8x8xf32> -> vector<2x8x8xf32>
    "tpu.trace_stop"() : () -> ()
    %cst_15 = arith.constant dense<0xFF800000> : vector<2x8xf32>
    %53 = vector.multi_reduction <maximumf>, %52, %cst_15 [2] : vector<2x8x8xf32> to vector<2x8xf32>
    %54 = vector.shape_cast %53 : vector<2x8xf32> to vector<2x8x1xf32>
    %55 = vector.broadcast %54 : vector<2x8x1xf32> to vector<2x8x8xf32>
    %56 = arith.subf %52, %55 : vector<2x8x8xf32>
    %57 = math.exp %56 : vector<2x8x8xf32>
    %cst_16 = arith.constant dense<0.000000e+00> : vector<2x8xf32>
    %58 = vector.multi_reduction <add>, %57, %cst_16 [2] : vector<2x8x8xf32> to vector<2x8xf32>
    %59 = vector.shape_cast %58 : vector<2x8xf32> to vector<2x8x1xf32>
    %60 = tpu.reciprocal %59 {approx = true} : vector<2x8x1xf32> -> vector<2x8x1xf32>
    %61 = vector.broadcast %60 : vector<2x8x1xf32> to vector<2x8x8xf32>
    %62 = arith.mulf %57, %61 : vector<2x8x8xf32>
    %63 = arith.truncf %62 : vector<2x8x8xf32> to vector<2x8x8xbf16>
    "tpu.trace_start"() <{level = 10 : i32, message = "bqk,bkd->bqd"}> : () -> ()
    %cst_17 = arith.constant dense<0.000000e+00> : vector<2x8x8xf32>
    %64 = tpu.matmul %63, %51, %cst_17 {dimension_numbers = #tpu.dot_dimension_numbers<[2], [1], [1], [2], [0, 0, 0, 1, 1, 2], [0], [0]>} : vector<2x8x8xbf16>, vector<2x8x8xbf16>, vector<2x8x8xf32> -> vector<2x8x8xf32>
    "tpu.trace_stop"() : () -> ()
    %65 = vector.extract_strided_slice %10 {offsets = [0, 0, 24], sizes = [2, 8, 8], strides = [1, 1, 1]} : vector<2x8x32xbf16> to vector<2x8x8xbf16>
    %66 = vector.extract_strided_slice %13 {offsets = [0, 0, 24], sizes = [2, 8, 8], strides = [1, 1, 1]} : vector<2x8x32xbf16> to vector<2x8x8xbf16>
    %67 = vector.extract_strided_slice %16 {offsets = [0, 0, 24], sizes = [2, 8, 8], strides = [1, 1, 1]} : vector<2x8x32xbf16> to vector<2x8x8xbf16>
    "tpu.trace_start"() <{level = 10 : i32, message = "bqd,bkd->bqk"}> : () -> ()
    %cst_18 = arith.constant dense<0.000000e+00> : vector<2x8x8xf32>
    %68 = tpu.matmul %65, %66, %cst_18 {dimension_numbers = #tpu.dot_dimension_numbers<[2], [2], [1], [1], [0, 0, 0, 1, 1, 1], [0], [0]>} : vector<2x8x8xbf16>, vector<2x8x8xbf16>, vector<2x8x8xf32> -> vector<2x8x8xf32>
    "tpu.trace_stop"() : () -> ()
    %cst_19 = arith.constant dense<0xFF800000> : vector<2x8xf32>
    %69 = vector.multi_reduction <maximumf>, %68, %cst_19 [2] : vector<2x8x8xf32> to vector<2x8xf32>
    %70 = vector.shape_cast %69 : vector<2x8xf32> to vector<2x8x1xf32>
    %71 = vector.broadcast %70 : vector<2x8x1xf32> to vector<2x8x8xf32>
    %72 = arith.subf %68, %71 : vector<2x8x8xf32>
    %73 = math.exp %72 : vector<2x8x8xf32>
    %cst_20 = arith.constant dense<0.000000e+00> : vector<2x8xf32>
    %74 = vector.multi_reduction <add>, %73, %cst_20 [2] : vector<2x8x8xf32> to vector<2x8xf32>
    %75 = vector.shape_cast %74 : vector<2x8xf32> to vector<2x8x1xf32>
    %76 = tpu.reciprocal %75 {approx = true} : vector<2x8x1xf32> -> vector<2x8x1xf32>
    %77 = vector.broadcast %76 : vector<2x8x1xf32> to vector<2x8x8xf32>
    %78 = arith.mulf %73, %77 : vector<2x8x8xf32>
    %79 = arith.truncf %78 : vector<2x8x8xf32> to vector<2x8x8xbf16>
    "tpu.trace_start"() <{level = 10 : i32, message = "bqk,bkd->bqd"}> : () -> ()
    %cst_21 = arith.constant dense<0.000000e+00> : vector<2x8x8xf32>
    %80 = tpu.matmul %79, %67, %cst_21 {dimension_numbers = #tpu.dot_dimension_numbers<[2], [1], [1], [2], [0, 0, 0, 1, 1, 2], [0], [0]>} : vector<2x8x8xbf16>, vector<2x8x8xbf16>, vector<2x8x8xf32> -> vector<2x8x8xf32>
    "tpu.trace_stop"() : () -> ()
    %81 = tpu.concatenate %32, %48, %64, %80 in 2 : vector<2x8x8xf32>, vector<2x8x8xf32>, vector<2x8x8xf32>, vector<2x8x8xf32> -> vector<2x8x32xf32>
    %82 = vector.shape_cast %81 : vector<2x8x32xf32> to vector<16x32xf32>
    %83 = arith.truncf %82 : vector<16x32xf32> to vector<16x32xbf16>
    %c0_22 = arith.constant 0 : index
    %c0_23 = arith.constant 0 : index
    %84 = vector.load %arg4[%c0_22, %c0_23] : memref<32x32xbf16, #tpu.memory_space<vmem>>, vector<32x32xbf16>
    %cst_24 = arith.constant dense<0.000000e+00> : vector<16x32xf32>
    %85 = tpu.matmul %83, %84, %cst_24 {dimension_numbers = #tpu.dot_dimension_numbers<[1], [0], [0], [1], [0, 0, 1, 1], [], []>} : vector<16x32xbf16>, vector<32x32xbf16>, vector<16x32xf32> -> vector<16x32xf32>
    %c0_25 = arith.constant 0 : index
    %c0_26 = arith.constant 0 : index
    %86 = vector.load %arg5[%c0_25, %c0_26] : memref<1x32xf32, #tpu.memory_space<vmem>>, vector<1x32xf32>
    %87 = vector.broadcast %86 : vector<1x32xf32> to vector<16x32xf32>
    %88 = arith.addf %85, %87 : vector<16x32xf32>
    %89 = arith.addf %1, %88 : vector<16x32xf32>
    %cst_27 = arith.constant dense<0.000000e+00> : vector<16xf32>
    %90 = vector.multi_reduction <add>, %89, %cst_27 [1] : vector<16x32xf32> to vector<16xf32>
    %91 = vector.shape_cast %90 : vector<16xf32> to vector<16x1xf32>
    %cst_28 = arith.constant 3.200000e+01 : f32
    %92 = vector.broadcast %cst_28 : f32 to vector<16x1xf32>
    %93 = arith.divf %91, %92 : vector<16x1xf32>
    %94 = vector.broadcast %93 : vector<16x1xf32> to vector<16x32xf32>
    %95 = arith.subf %89, %94 : vector<16x32xf32>
    %96 = arith.mulf %95, %95 : vector<16x32xf32>
    %cst_29 = arith.constant dense<0.000000e+00> : vector<16xf32>
    %97 = vector.multi_reduction <add>, %96, %cst_29 [1] : vector<16x32xf32> to vector<16xf32>
    %98 = vector.shape_cast %97 : vector<16xf32> to vector<16x1xf32>
    %cst_30 = arith.constant 3.200000e+01 : f32
    %99 = vector.broadcast %cst_30 : f32 to vector<16x1xf32>
    %100 = arith.divf %98, %99 : vector<16x1xf32>
    %101 = vector.broadcast %93 : vector<16x1xf32> to vector<16x32xf32>
    %102 = arith.subf %89, %101 : vector<16x32xf32>
    %cst_31 = arith.constant 9.99999997E-7 : f32
    %103 = vector.broadcast %cst_31 : f32 to vector<16x1xf32>
    %104 = arith.addf %100, %103 : vector<16x1xf32>
    %105 = math.rsqrt %104 : vector<16x1xf32>
    %106 = vector.broadcast %105 : vector<16x1xf32> to vector<16x32xf32>
    %107 = arith.mulf %102, %106 : vector<16x32xf32>
    %c0_32 = arith.constant 0 : index
    %c0_33 = arith.constant 0 : index
    %108 = vector.load %arg6[%c0_32, %c0_33] : memref<1x32xf32, #tpu.memory_space<vmem>>, vector<1x32xf32>
    %109 = vector.broadcast %108 : vector<1x32xf32> to vector<16x32xf32>
    %110 = arith.mulf %107, %109 : vector<16x32xf32>
    %c0_34 = arith.constant 0 : index
    %c0_35 = arith.constant 0 : index
    %111 = vector.load %arg7[%c0_34, %c0_35] : memref<1x32xf32, #tpu.memory_space<vmem>>, vector<1x32xf32>
    %112 = vector.broadcast %111 : vector<1x32xf32> to vector<16x32xf32>
    %113 = arith.addf %110, %112 : vector<16x32xf32>
    %114 = arith.truncf %113 : vector<16x32xf32> to vector<16x32xbf16>
    %c0_36 = arith.constant 0 : index
    %c0_37 = arith.constant 0 : index
    %115 = vector.load %arg8[%c0_36, %c0_37] : memref<32x64xbf16, #tpu.memory_space<vmem>>, vector<32x64xbf16>
    %cst_38 = arith.constant dense<0.000000e+00> : vector<16x64xf32>
    %116 = tpu.matmul %114, %115, %cst_38 {dimension_numbers = #tpu.dot_dimension_numbers<[1], [0], [0], [1], [0, 0, 1, 1], [], []>} : vector<16x32xbf16>, vector<32x64xbf16>, vector<16x64xf32> -> vector<16x64xf32>
    %c0_39 = arith.constant 0 : index
    %c0_40 = arith.constant 0 : index
    %117 = vector.load %arg9[%c0_39, %c0_40] : memref<1x64xf32, #tpu.memory_space<vmem>>, vector<1x64xf32>
    %118 = vector.broadcast %117 : vector<1x64xf32> to vector<16x64xf32>
    %119 = arith.addf %116, %118 : vector<16x64xf32>
    %cst_41 = arith.constant 0.000000e+00 : f32
    %120 = vector.broadcast %cst_41 : f32 to vector<16x64xf32>
    %121 = arith.maximumf %119, %120 : vector<16x64xf32>
    %122 = arith.truncf %121 : vector<16x64xf32> to vector<16x64xbf16>
    %c0_42 = arith.constant 0 : index
    %c0_43 = arith.constant 0 : index
    %123 = vector.load %arg10[%c0_42, %c0_43] : memref<64x32xbf16, #tpu.memory_space<vmem>>, vector<64x32xbf16>
    %cst_44 = arith.constant dense<0.000000e+00> : vector<16x32xf32>
    %124 = tpu.matmul %122, %123, %cst_44 {dimension_numbers = #tpu.dot_dimension_numbers<[1], [0], [0], [1], [0, 0, 1, 1], [], []>} : vector<16x64xbf16>, vector<64x32xbf16>, vector<16x32xf32> -> vector<16x32xf32>
    %c0_45 = arith.constant 0 : index
    %c0_46 = arith.constant 0 : index
    %125 = vector.load %arg11[%c0_45, %c0_46] : memref<1x32xf32, #tpu.memory_space<vmem>>, vector<1x32xf32>
    %126 = vector.broadcast %125 : vector<1x32xf32> to vector<16x32xf32>
    %127 = arith.addf %124, %126 : vector<16x32xf32>
    %128 = arith.addf %113, %127 : vector<16x32xf32>
    %cst_47 = arith.constant dense<0.000000e+00> : vector<16xf32>
    %129 = vector.multi_reduction <add>, %128, %cst_47 [1] : vector<16x32xf32> to vector<16xf32>
    %130 = vector.shape_cast %129 : vector<16xf32> to vector<16x1xf32>
    %cst_48 = arith.constant 3.200000e+01 : f32
    %131 = vector.broadcast %cst_48 : f32 to vector<16x1xf32>
    %132 = arith.divf %130, %131 : vector<16x1xf32>
    %133 = vector.broadcast %132 : vector<16x1xf32> to vector<16x32xf32>
    %134 = arith.subf %128, %133 : vector<16x32xf32>
    %135 = arith.mulf %134, %134 : vector<16x32xf32>
    %cst_49 = arith.constant dense<0.000000e+00> : vector<16xf32>
    %136 = vector.multi_reduction <add>, %135, %cst_49 [1] : vector<16x32xf32> to vector<16xf32>
    %137 = vector.shape_cast %136 : vector<16xf32> to vector<16x1xf32>
    %cst_50 = arith.constant 3.200000e+01 : f32
    %138 = vector.broadcast %cst_50 : f32 to vector<16x1xf32>
    %139 = arith.divf %137, %138 : vector<16x1xf32>
    %140 = vector.broadcast %132 : vector<16x1xf32> to vector<16x32xf32>
    %141 = arith.subf %128, %140 : vector<16x32xf32>
    %cst_51 = arith.constant 9.99999997E-7 : f32
    %142 = vector.broadcast %cst_51 : f32 to vector<16x1xf32>
    %143 = arith.addf %139, %142 : vector<16x1xf32>
    %144 = math.rsqrt %143 : vector<16x1xf32>
    %145 = vector.broadcast %144 : vector<16x1xf32> to vector<16x32xf32>
    %146 = arith.mulf %141, %145 : vector<16x32xf32>
    %c0_52 = arith.constant 0 : index
    %c0_53 = arith.constant 0 : index
    %147 = vector.load %arg12[%c0_52, %c0_53] : memref<1x32xf32, #tpu.memory_space<vmem>>, vector<1x32xf32>
    %148 = vector.broadcast %147 : vector<1x32xf32> to vector<16x32xf32>
    %149 = arith.mulf %146, %148 : vector<16x32xf32>
    %c0_54 = arith.constant 0 : index
    %c0_55 = arith.constant 0 : index
    %150 = vector.load %arg13[%c0_54, %c0_55] : memref<1x32xf32, #tpu.memory_space<vmem>>, vector<1x32xf32>
    %151 = vector.broadcast %150 : vector<1x32xf32> to vector<16x32xf32>
    %152 = arith.addf %149, %151 : vector<16x32xf32>
    %153 = vector.shape_cast %152 : vector<16x32xf32> to vector<2x8x32xf32>
    %c0_56 = arith.constant 0 : index
    %c0_57 = arith.constant 0 : index
    %c0_58 = arith.constant 0 : index
    %154 = vector.load %arg14[%c0_56, %c0_57, %c0_58] : memref<2x8x32xf32, #tpu.memory_space<vmem>>, vector<2x8x32xf32>
    tpu.vector_store %arg14[%c0_56, %c0_57, %c0_58], %153 {strides = array<i32>} : memref<2x8x32xf32, #tpu.memory_space<vmem>>, vector<2x8x32xf32>,
    return
  }
  func.func @transform_0(%arg0: i32) -> (i32, i32, i32) {
    %c0_i32 = arith.constant 0 : i32
    %c0_i32_0 = arith.constant 0 : i32
    %c0_i32_1 = arith.constant 0 : i32
    return %arg0, %c0_i32, %c0_i32_0 : i32, i32, i32
  }
  func.func @transform_1(%arg0: i32) -> (i32, i32) {
    %c0_i32 = arith.constant 0 : i32
    %c0_i32_0 = arith.constant 0 : i32
    %c0_i32_1 = arith.constant 0 : i32
    return %c0_i32, %c0_i32_0 : i32, i32
  }
  func.func @transform_2(%arg0: i32) -> (i32, i32) {
    %c0_i32 = arith.constant 0 : i32
    %c0_i32_0 = arith.constant 0 : i32
    %c0_i32_1 = arith.constant 0 : i32
    return %c0_i32, %c0_i32_0 : i32, i32
  }
  func.func @transform_3(%arg0: i32) -> (i32, i32) {
    %c0_i32 = arith.constant 0 : i32
    %c0_i32_0 = arith.constant 0 : i32
    %c0_i32_1 = arith.constant 0 : i32
    return %c0_i32, %c0_i32_0 : i32, i32
  }
  func.func @transform_4(%arg0: i32) -> (i32, i32) {
    %c0_i32 = arith.constant 0 : i32
    %c0_i32_0 = arith.constant 0 : i32
    %c0_i32_1 = arith.constant 0 : i32
    return %c0_i32, %c0_i32_0 : i32, i32
  }
  func.func @transform_5(%arg0: i32) -> (i32, i32) {
    %c0_i32 = arith.constant 0 : i32
    %c0_i32_0 = arith.constant 0 : i32
    %c0_i32_1 = arith.constant 0 : i32
    return %c0_i32, %c0_i32_0 : i32, i32
  }
  func.func @transform_6(%arg0: i32) -> (i32, i32) {
    %c0_i32 = arith.constant 0 : i32
    %c0_i32_0 = arith.constant 0 : i32
    %c0_i32_1 = arith.constant 0 : i32
    return %c0_i32, %c0_i32_0 : i32, i32
  }
  func.func @transform_7(%arg0: i32) -> (i32, i32) {
    %c0_i32 = arith.constant 0 : i32
    %c0_i32_0 = arith.constant 0 : i32
    %c0_i32_1 = arith.constant 0 : i32
    return %c0_i32, %c0_i32_0 : i32, i32
  }
  func.func @transform_8(%arg0: i32) -> (i32, i32) {
    %c0_i32 = arith.constant 0 : i32
    %c0_i32_0 = arith.constant 0 : i32
    %c0_i32_1 = arith.constant 0 : i32
    return %c0_i32, %c0_i32_0 : i32, i32
  }
  func.func @transform_9(%arg0: i32) -> (i32, i32) {
    %c0_i32 = arith.constant 0 : i32
    %c0_i32_0 = arith.constant 0 : i32
    %c0_i32_1 = arith.constant 0 : i32
    return %c0_i32, %c0_i32_0 : i32, i32
  }
  func.func @transform_10(%arg0: i32) -> (i32, i32) {
    %c0_i32 = arith.constant 0 : i32
    %c0_i32_0 = arith.constant 0 : i32
    %c0_i32_1 = arith.constant 0 : i32
    return %c0_i32, %c0_i32_0 : i32, i32
  }
  func.func @transform_11(%arg0: i32) -> (i32, i32) {
    %c0_i32 = arith.constant 0 : i32
    %c0_i32_0 = arith.constant 0 : i32
    %c0_i32_1 = arith.constant 0 : i32
    return %c0_i32, %c0_i32_0 : i32, i32
  }
  func.func @transform_12(%arg0: i32) -> (i32, i32) {
    %c0_i32 = arith.constant 0 : i32
    %c0_i32_0 = arith.constant 0 : i32
    %c0_i32_1 = arith.constant 0 : i32
    return %c0_i32, %c0_i32_0 : i32, i32
  }
  func.func @transform_13(%arg0: i32) -> (i32, i32, i32) {
    %c0_i32 = arith.constant 0 : i32
    %c0_i32_0 = arith.constant 0 : i32
    %c0_i32_1 = arith.constant 0 : i32
    return %arg0, %c0_i32, %c0_i32_0 : i32, i32, i32
  }
}

</mosaic_0001>

<bundles_post_ra>
// kernel: tpu_custom_call.1
= control target key start
LH: loop header
LB: loop body
LE: loop exit
PB: predicated region body
PF: predicated region fallthrough
CT: control target
= control target key end

     0   :  { %18 = vsyncpa [#allocation3], 0  ;;  %s2106_s0 = inlined_call_operand.vmem [shape: f32[4,8,32], index: 0, kind: input, shape index: {}]   ;;  %s2107_s1 = inlined_call_operand.vmem [shape: bf16[32,96], index: 1, kind: input, shape index: {}]   ;;  %s2108_s2 = inlined_call_operand.vmem [shape: f32[1,96], index: 2, kind: input, shape index: {}]   ;;  %s2109_s3 = inlined_call_operand.hbm [shape: bf16[32,32], index: 3, kind: input, shape index: {}]   ;;  %s2110_s4 = inlined_call_operand.vmem [shape: f32[1,32], index: 4, kind: input, shape index: {}]   ;;  %s2111_s5 = inlined_call_operand.vmem [shape: f32[1,32], index: 5, kind: input, shape index: {}]   ;;  %s2112_s6 = inlined_call_operand.vmem [shape: f32[1,32], index: 6, kind: input, shape index: {}]   ;;  %s2113_s7 = inlined_call_operand.hbm [shape: bf16[32,64], index: 7, kind: input, shape index: {}]   ;;  %s2114_s8 = inlined_call_operand.vmem [shape: f32[1,64], index: 8, kind: input, shape index: {}]   ;;  %s2115_s9 = inlined_call_operand.vmem [shape: bf16[64,32], index: 9, kind: input, shape index: {}]   ;;  %s2116_s10 = inlined_call_operand.vmem [shape: f32[1,32], index: 10, kind: input, shape index: {}]   ;;  %s2117_s11 = inlined_call_operand.vmem [shape: f32[1,32], index: 11, kind: input, shape index: {}]   ;;  %s2118_s12 = inlined_call_operand.vmem [shape: f32[1,32], index: 12, kind: input, shape index: {}]   ;;  %s2119_s13 = inlined_call_operand.hbm [shape: f32[4,8,32], index: 13, kind: output, shape index: {}]  }
   0x1   :  { %19 = vsyncpa [#allocation6], 0 }
   0x2   :  { %20 = vsyncpa [#allocation4], 0 }
   0x3   :  { %22 = vsyncpa [#allocation4 + $0x1], 0  ;;  %s1814_s25 = smov 0   ;;  %s1816_s26 = smov 0  }
   0x4   :  { %s1818_s27 = smov 0   ;;  %s1820_s28 = smov 0  }
   0x5 LB: > { %2124 = sst [smem:[#allocation11_spill]] %s1718_s27  ;;  %s1835_s29 = sadd.s32 4294967295, %s1722_s28   ;;  %s1722_s28 = sphi %s1820_s28, %s2132_s28   ;;  %s1718_s27 = sphi %s1818_s27, %s2134_s27   ;;  %s1714_s26 = sphi %s1816_s26, %s2136_s26   ;;  %s1710_s25 = sphi %s1814_s25, %s2135_s25  }
   0x6   : > { %s1362_s30 = sadd.s32 4294967294, %s1722_s28   ;;  %s1839_s14 = sadd.s32 1, %s1722_s28  }
   0x7   : > { %2125 = sst [smem:[#allocation12_spill]] %s1839_s14  ;;  %s313_s15 = sadd.s32 1, %s1718_s27 }
   0x8   : > { %s310_s16 = ssub.s32 %s1722_s28, %s1839_s14  ;;  %p323_p0 = scmp.ne.s32.totalorder %s1718_s27, %s1714_s26 }
   0x9   : > { %p311_p1 = scmp.eq.s32.totalorder %s310_s16, 0  ;;  %p324_p2 = scmp.eq.s32.totalorder %s1835_s29, 1 }
   0xa   : > { %p329_p3 = scmp.ne.s32.totalorder %s1714_s26, %s1710_s25  ;;  %p330_p4 = scmp.eq.s32.totalorder %s1362_s30, 1 }
   0xb   : > { %s1850_s17 = scalar_select %p311_p1, %s1718_s27, %s313_s15  }
   0xc   : > { %p1852_p5 = por %p324_p2, %p323_p0  ;;  %p1856_p6 = por %p330_p4, %p329_p3 }
   0xd   : > { %2126 = sst [smem:[#allocation13_spill]] %s1850_s17  ;;  %p1363_p7 = scmp.ge.s32.totalorder %s1722_s28, 1 }
   0xe   : > { %s2128_s19 = scalar_select %p1856_p6, 1, 0 }
   0xf   : > { %p337_p8 = scmp.lt.s32.totalorder %s1722_s28, 3  ;;  %p1470_p9 = scmp.eq.s32.totalorder %s1835_s29, 0 }
  0x10   : > { %2129 = sst [smem:[#allocation14_spill]] %s2128_s19  ;;  %s354_s23 = sshll.u32 %s2109_s3, 4  ;;  %s355_s23 = int_to_ptr.hbm [resolvable:$true] %s354_s23 }
  0x11   : > { %p1863_p10 = pnand %p1363_p7, %p337_p8  ;;  %s1724_s24 = smov [#allocation2]  }
  0x12   : > { %s356_s30 = sshll.u32 %s1724_s24, 4  ;;  %s377_s17 = sshll.u32 %s2113_s7, 4  ;;  %s357_s30 = int_to_ptr.vmem [resolvable:$true] %s356_s30  ;;  %s378_s17 = int_to_ptr.hbm [resolvable:$true] %s377_s17 }
  0x13   : > { %p1459_p11 = pneg %p1863_p10  ;;  %s1725_s27 = smov 64  }
  0x14   : > { %s1726_s14 = smov 4   ;;  %s1727_s19 = smov [#allocation5]  }
  0x15   : > { %p1460_p12 = pnand %p1470_p9, %p1459_p11  ;;  %s379_s21 = sshll.u32 %s1727_s19, 4  ;;  %s380_s21 = int_to_ptr.vmem [resolvable:$true] %s379_s21 }
  0x16   : > { %419 = sbr.rel (%p1863_p10) target bundleno = 1995 (0x7cb), region = 72 }
  0x17   : > { %1462 = dma.hbm_to_vmem [thread:$0]  (!%p1460_p12), %s355_s23, 256, %s357_s30, [#allocation3], %s1725_s27, %s1725_s27, %s1726_s14  }
  0x18   : > { %1465 = dma.hbm_to_vmem [thread:$0]  (!%p1460_p12), %s378_s17, 256, %s380_s21, [#allocation6], %s1725_s27, %s1725_s27, %s1726_s14  }
  0x1b   : > { %1697 = dma.done.wait (%p1470_p9), [#allocation3], 256  }
  0x1c   : > { %1699 = vsyncadd (%p1470_p9), [#allocation3], 4294967040 }
  0x1d   : > { %1701 = dma.done.wait (%p1470_p9), [#allocation6], 256  }
  0x1e   : > { %1703 = vsyncadd (%p1470_p9), [#allocation6], 4294967040  ;;  %s1371_s22 = sshll.u32 %s1835_s29, 1  ;;  %v1439_v0 = vld [vmem:[%s2107_s1 + $0x8] sm:$0xff]  ;;  %v1438_v1 = vld [vmem:[%s2107_s1] sm:$0xff]  ;;  %vm500_vm0 = vcmask 261120  }
  0x1f   : > { %p470_p13 = scmp.lt.s32.totalorder %s1371_s22, 3  ;;  %510 = vmatpush.bf16.msra.mxu0 %v1439_v0  ;;  %v1542_v5 = vld [vmem:[%s2108_s2] ss:$0 sm:$0xff]  ;;  %s1728_s21 = smov 120   ;;  %vm525_vm1 = vcmask 64512   ;;  %vm598_vm2 = vcmask 1043456  }
  0x20   : > { %s1731_s14 = smov 112   ;;  %s1732_s17 = smov 80   ;;  %vm998_vm3 = vcmask 130048   ;;  %vm1001_vm4 = vcmask 195584   ;;  %vm1184_vm12 = vcmask 523264  }
  0x21   : > { %s2138_s22 = smov (!%p470_p13, %s1371_s22), 3  ;;  %s1734_s20 = smov 104  }
  0x22   : > { %s1372_s27 = sshll.u32 %s2138_s22, 3  ;;  %s1729_s22 = smov 88  }
  0x23   : > { %s473_s19 = scalar_lea.vmem %s2106_s0, %s1372_s27  ;;  %511 = vmatpush.bf16.msra.mxu0 %v1438_v1  ;;  %s1730_s27 = smov 96  }
  0x24   : > { %v1897_v2 = vld [vmem:[%s473_s19] sm:$0xff]  ;;  %v1899_v3 = vld [vmem:[%s473_s19 + $0x8] sm:$0xff]  ;;  %s1733_s19 = smov 72   ;;  %s1735_s23 = smov 64  }
  0x25   : > { %v479_v4 = vpack.c.bf16 %v1899_v3, %v1897_v2  ;;  %s1736_s24 = smov 56   ;;  %s1737_s30 = smov 48  }
  0x26   : > { %s1738_s15 = smov 40   ;;  %s1739_s16 = smov 8  }
  0x27   : > { %1381 = vmatmul.msk.bf16.vlgmr.msra.gmra.mxu0 %vm500_vm0, %v479_v4 }
  0xa4   : > { %v513_v6 = vpop.f32.mrf.mxu0 }
  0xa5   : > { %v514_v7 = vadd.f32 %v1542_v5, %v513_v6 }
  0xa7   : > { %v518_v8 = vpack.c.bf16 %v514_v7, %v514_v7 }
  0xa9   : > { %v521_v9 = vunpack.c.l.b16 %v518_v8 }
  0xab   : > { %v1907_v10 = vpack.c.b16 %v521_v9, %v521_v9 }
  0xac   : > { %v515_v11 = vpop.f32.mrf.mxu0 }
  0xad   : > { %v516_v12 = vadd.f32 %v1542_v5, %v515_v11  ;;  %636 = vrot.lane.b32.xlu2 %v1907_v10, %s1728_s21  ;;  %638 = vrot.lane.b32.xlu1 %v1907_v10, %s1729_s22 }
  0xae   : > { %523 = vrot.lane.b32.xlu0 %v1907_v10, %s1730_s27 }
  0xaf   : > { %v519_v13 = vpack.c.bf16 %v516_v12, %v516_v12 }
  0xb1   : > { %v546_v14 = vunpack.c.l.b16 %v519_v13 }
  0xb3   : > { %v1912_v15 = vpack.c.b16 %v546_v14, %v546_v14 }
  0xb5   : > { %659 = vrot.lane.b32.xlu2 %v1912_v15, %s1728_s21  ;;  %661 = vrot.lane.b32.xlu1 %v1912_v15, %s1729_s22  ;;  %s1740_s21 = smov 16   ;;  %s1741_s22 = smov 24  }
  0xb6   : > { %548 = vrot.lane.b32.xlu0 %v1912_v15, %s1730_s27 }
  0xbd   : > { %748 = vrot.lane.b32.xlu2 %v1907_v10, %s1731_s14  ;;  %773 = vrot.lane.b32.xlu1 %v1912_v15, %s1732_s17 }
  0xbe   : > { %750 = vrot.lane.b32.xlu0 %v1907_v10, %s1732_s17  ;;  %s1448_s17 = sshll.u32 %s1835_s29, 4 }
  0xc5   : > { %885 = vrot.lane.b32.xlu2 %v1912_v15, %s1733_s19  ;;  %862 = vrot.lane.b32.xlu1 %v1907_v10, %s1733_s19 }
  0xc6   : > { %771 = vrot.lane.b32.xlu0 %v1912_v15, %s1731_s14 }
  0xcd   : > { %883 = vrot.lane.b32.xlu1 %v1912_v15, %s1734_s20 }
  0xce   : > { %860 = vrot.lane.b32.xlu0 %v1907_v10, %s1734_s20  ;;  %s1672_s20 = scalar_lea.hbm %s2119_s13, 32 }
 0x107   : > { %v637_v16 = vpop.permute.xlu2 %636 }
 0x10f   : > { %v660_v21 = vpop.permute.xlu2 %659 }
 0x117   : > { %v749_v26 = vpop.permute.xlu2 %748 }
 0x11f   : > { %v639_v17 = vpop.permute.xlu1 %638  ;;  %v886_v31 = vpop.permute.xlu2 %885 }
 0x120   : > { %v524_v18 = vpop.permute.xlu0 %523  ;;  %v644_v19 = vsel %vm525_vm1, %v639_v17, 0  ;;  %v891_v34 = vsel %vm525_vm1, %v886_v31, 0 }
 0x121   : > { %v530_v20 = vsel %vm525_vm1, %v524_v18, 0  ;;  %653 = vmatpush.bf16.xpose.msrb.mxu0 %v644_v19 }
 0x122   : > { %539 = vmatpush.bf16.xpose.msra.mxu1 %v530_v20 }
 0x127   : > { %v662_v22 = vpop.permute.xlu1 %661 }
 0x128   : > { %v549_v23 = vpop.permute.xlu0 %548  ;;  %1386 = vmatmul.msk.bf16.vlgmr.msrb.gmra.mxu0 %vm525_vm1, %v637_v16  ;;  %v667_v24 = vsel %vm525_vm1, %v662_v22, 0 }
 0x129   : > { %1382 = vmatmul.msk.bf16.vlgmr.msra.gmra.mxu1 %vm525_vm1, %v518_v8  ;;  %v554_v25 = vsel %vm525_vm1, %v549_v23, 0 }
 0x12a   : > { %563 = vmatpush.bf16.xpose.msra.mxu2 %v554_v25  ;;  %676 = vmatpush.bf16.xpose.msrb.mxu1 %v667_v24 }
 0x12f   : > { %v774_v27 = vpop.permute.xlu1 %773 }
 0x130   : > { %v779_v28 = vsel %vm525_vm1, %v774_v27, 0  ;;  %v751_v29 = vpop.permute.xlu0 %750 }
 0x131   : > { %v756_v30 = vsel %vm525_vm1, %v751_v29, 0  ;;  %1383 = vmatmul.msk.bf16.vlgmr.msra.gmra.mxu2 %vm525_vm1, %v519_v13 }
 0x132   : > { %788 = vmatpush.bf16.xpose.msra.mxu1 %v779_v28  ;;  %765 = vmatpush.bf16.xpose.msra.mxu0 %v756_v30 }
 0x137   : > { %v863_v32 = vpop.permute.xlu1 %862 }
 0x138   : > { %v868_v33 = vsel %vm525_vm1, %v863_v32, 0  ;;  %v772_v35 = vpop.permute.xlu0 %771 }
 0x139   : > { %1387 = vmatmul.msk.bf16.vlgmr.msrb.gmra.mxu1 %vm525_vm1, %v660_v21  ;;  %1390 = vmatmul.msk.bf16.vlgmr.msra.gmra.mxu0 %vm525_vm1, %v749_v26 }
 0x13a   : > { %900 = vmatpush.bf16.xpose.msrb.mxu1 %v891_v34  ;;  %877 = vmatpush.bf16.xpose.msrb.mxu0 %v868_v33 }
 0x13f   : > { %v884_v37 = vpop.permute.xlu1 %883 }
 0x140   : > { %v861_v36 = vpop.permute.xlu0 %860 }
 0x149   : > { %1391 = vmatmul.msk.bf16.vlgmr.msra.gmra.mxu1 %vm525_vm1, %v772_v35  ;;  %1394 = vmatmul.msk.bf16.vlgmr.msrb.gmra.mxu0 %vm525_vm1, %v861_v36 }
 0x159   : > { %1395 = vmatmul.msk.bf16.vlgmr.msrb.gmra.mxu1 %vm525_vm1, %v884_v37 }
 0x1a5   : > { %v655_v38 = vpop.f32.mrf.mxu0 }
 0x1a6   : > { %v541_v39 = vpop.f32.mrf.mxu1  ;;  %v682_v40 = vsel %vm525_vm1, %v655_v38, -inf }
 0x1a7   : > { %683 = vmax.xlane.f32.xlu1 %v682_v40  ;;  %v569_v41 = vsel %vm525_vm1, %v541_v39, -inf }
 0x1a8   : > { %570 = vmax.xlane.f32.xlu2 %v569_v41 }
 0x1ad   : > { %v657_v42 = vpop.f32.mrf.mxu0 }
 0x1ae   : > { %v543_v43 = vpop.f32.mrf.mxu1 }
 0x1b4   : > { %v565_v44 = vpop.f32.mrf.mxu2 }
 0x1b5   : > { %v572_v45 = vsel %vm525_vm1, %v565_v44, -inf }
 0x1b6   : > { %v678_v46 = vpop.f32.mrf.mxu1  ;;  %573 = vmax.xlane.f32.xlu0 %v572_v45  ;;  %v1944_v47 = vpop.f32.mrf.mxu0 }
 0x1b7   : > { %v685_v48 = vsel %vm525_vm1, %v678_v46, -inf  ;;  %v794_v60 = vsel %vm525_vm1, %v1944_v47, -inf }
 0x1b8   : > { %686 = vmax.xlane.f32.xlu2 %v685_v48 }
 0x1bc   : > { %v567_v49 = vpop.f32.mrf.mxu2 }
 0x1be   : > { %v680_v50 = vpop.f32.mrf.mxu1  ;;  %v769_v51 = vpop.f32.mrf.mxu0 }
 0x1c0   : > { %615 = vrot.lane.b32.xlu1 %v1912_v15, %s1735_s23 }
 0x1c6   : > { %v1948_v52 = vpop.f32.mrf.mxu1  ;;  %v1950_v53 = vpop.f32.mrf.mxu0 }
 0x1c7   : > { %v797_v59 = vsel %vm525_vm1, %v1948_v52, -inf  ;;  %v906_v61 = vsel %vm525_vm1, %v1950_v53, -inf }
 0x1c8   : > { %727 = vrot.lane.b32.xlu1 %v1912_v15, %s1736_s24 }
 0x1ca   : > { %706 = vrot.lane.b32.xlu0 %v1907_v10, %s1736_s24  ;;  %s1274_s24 = scalar_lea.hbm %s2119_s13, %s1448_s17 }
 0x1ce   : > { %v792_v54 = vpop.f32.mrf.mxu1  ;;  %v881_v55 = vpop.f32.mrf.mxu0 }
 0x1d0   : > { %593 = vrot.lane.b32.xlu2 %v1907_v10, %s1735_s23 }
 0x1d6   : > { %v902_v56 = vpop.f32.mrf.mxu1 }
 0x1d7   : > { %v909_v58 = vsel %vm525_vm1, %v902_v56, -inf }
 0x1de   : > { %v904_v57 = vpop.f32.mrf.mxu1 }
 0x1f2   : > { %910 = vmax.xlane.f32.xlu1 %v909_v58 }
 0x1f4   : > { %798 = vmax.xlane.f32.xlu0 %v797_v59 }
 0x1f9   : > { %795 = vmax.xlane.f32.xlu2 %v794_v60 }
 0x1fc   : > { %907 = vmax.xlane.f32.xlu0 %v906_v61 }
 0x21a   : > { %v684_v62 = vpop.xlane.xlu1 %683 }
 0x21b   : > { %v688_v63 = vsub.f32 %v655_v38, %v684_v62  ;;  %v571_v0 = vpop.xlane.xlu2 %570 }
 0x21c   : > { %v575_v1 = vsub.f32 %v541_v39, %v571_v0 }
 0x21d   : > { %v690_v4 = vmul.f32 1.442695, %v688_v63 }
 0x21e   : > { %v577_v5 = vmul.f32 1.442695, %v575_v1 }
 0x21f   : > { %1550 = vpow2.f32 %v690_v4 }
 0x220   : > { %1552 = vpow2.f32 %v577_v5 }
 0x225   : > { %v1962_v6 = vpop.eup %1550 }
 0x226   : > { %v1964_v7 = vpop.eup %1552  ;;  %v694_v8 = vsel %vm525_vm1, %v1962_v6, 0.0 }
 0x227   : > { %v581_v9 = vsel %vm525_vm1, %v1964_v7, 0.0  ;;  %695 = vadd.xlane.f32.xlu0 %v694_v8 }
 0x228   : > { %582 = vadd.xlane.f32.xlu1 %v581_v9 }
 0x229   : > { %v574_v11 = vpop.xlane.xlu0 %573 }
 0x22a   : > { %v576_v12 = vsub.f32 %v565_v44, %v574_v11 }
 0x22b   : > { %v687_v13 = vpop.xlane.xlu2 %686 }
 0x22c   : > { %v579_v14 = vmul.f32 1.442695, %v576_v12  ;;  %v689_v16 = vsub.f32 %v678_v46, %v687_v13 }
 0x22e   : > { %1554 = vpow2.f32 %v579_v14  ;;  %v692_v17 = vmul.f32 1.442695, %v689_v16 }
 0x230   : > { %1556 = vpow2.f32 %v692_v17 }
 0x232   : > { %v616_v18 = vpop.permute.xlu1 %615 }
 0x233   : > { %v594_v19 = vpop.permute.xlu2 %593  ;;  %v621_v20 = vsel %vm598_vm2, %v616_v18, 0 }
 0x234   : > { %v1971_v21 = vpop.eup %1554  ;;  %v600_v22 = vsel %vm598_vm2, %v594_v19, 0 }
 0x235   : > { %609 = vmatpush.bf16.msra.mxu3 %v600_v22  ;;  %v584_v23 = vsel %vm525_vm1, %v1971_v21, 0.0 }
 0x236   : > { %v1976_v24 = vpop.eup %1556  ;;  %585 = vadd.xlane.f32.xlu0 %v584_v23 }
 0x237   : > { %v697_v25 = vsel %vm525_vm1, %v1976_v24, 0.0 }
 0x238   : > { %698 = vadd.xlane.f32.xlu2 %v697_v25 }
 0x239   : > { %630 = vmatpush.bf16.msrb.mxu3 %v621_v20 }
 0x23a   : > { %v728_v28 = vpop.permute.xlu1 %727 }
 0x23b   : > { %v733_v57 = vsel %vm598_vm2, %v728_v28, 0 }
 0x23c   : > { %v707_v26 = vpop.permute.xlu0 %706 }
 0x23d   : > { %v712_v27 = vsel %vm598_vm2, %v707_v26, 0 }
 0x23e   : > { %721 = vmatpush.bf16.msrb.mxu2 %v712_v27 }
 0x241   : > { %839 = vrot.lane.b32.xlu1 %v1912_v15, %s1737_s30 }
 0x250   : > { %818 = vrot.lane.b32.xlu2 %v1907_v10, %s1737_s30  ;;  %s466_s30 = sand.u32 1, %s1714_s26  }
 0x251   : > { %s1370_s14 = sshll.u32 %s466_s30, 4  ;;  %s1263_s29 = scalar_lea.sflag [#allocation4], %s466_s30 }
 0x252   : > { %s468_s19 = scalar_lea.vmem [#allocation7], %s1370_s14 }
 0x265   : > { %v911_v29 = vpop.xlane.xlu1 %910 }
 0x266   : > { %v913_v30 = vsub.f32 %v902_v56, %v911_v29 }
 0x267   : > { %v799_v31 = vpop.xlane.xlu0 %798 }
 0x268   : > { %v801_v32 = vsub.f32 %v1948_v52, %v799_v31  ;;  %v916_v34 = vmul.f32 1.442695, %v913_v30 }
 0x26a   : > { %v804_v33 = vmul.f32 1.442695, %v801_v32 }
 0x26c   : > { %1558 = vpow2.f32 %v804_v33  ;;  %v796_v35 = vpop.xlane.xlu2 %795 }
 0x26d   : > { %v800_v36 = vsub.f32 %v1944_v47, %v796_v35  ;;  %1560 = vpow2.f32 %v916_v34 }
 0x26f   : > { %v802_v37 = vmul.f32 1.442695, %v800_v36  ;;  %v908_v38 = vpop.xlane.xlu0 %907 }
 0x270   : > { %v912_v39 = vsub.f32 %v1950_v53, %v908_v38 }
 0x271   : > { %1562 = vpow2.f32 %v802_v37 }
 0x272   : > { %v1559_v40 = vpop.eup %1558  ;;  %v914_v41 = vmul.f32 1.442695, %v912_v39 }
 0x273   : > { %v809_v42 = vsel %vm525_vm1, %v1559_v40, 0.0  ;;  %v1987_v43 = vpop.eup %1560 }
 0x274   : > { %1564 = vpow2.f32 %v914_v41  ;;  %810 = vadd.xlane.f32.xlu0 %v809_v42  ;;  %v921_v46 = vsel %vm525_vm1, %v1987_v43, 0.0 }
 0x277   : > { %v1563_v44 = vpop.eup %1562 }
 0x278   : > { %v806_v45 = vsel %vm525_vm1, %v1563_v44, 0.0 }
 0x279   : > { %807 = vadd.xlane.f32.xlu1 %v806_v45  ;;  %922 = vadd.xlane.f32.xlu2 %v921_v46 }
 0x27a   : > { %v1565_v47 = vpop.eup %1564 }
 0x27b   : > { %v918_v48 = vsel %vm525_vm1, %v1565_v47, 0.0 }
 0x27c   : > { %919 = vadd.xlane.f32.xlu0 %v918_v48  ;;  %v1440_v48 = vld [vmem:[#allocation2] sm:$0xff] }
 0x290   : > { %930 = vrot.lane.b32.xlu0 %v1907_v10, %s1738_s15 }
 0x292   : > { %951 = vrot.lane.b32.xlu1 %v1912_v15, %s1738_s15  ;;  %s1275_s15 = sshll.u32 %s468_s19, 4  ;;  %s1276_s15 = int_to_ptr.vmem [resolvable:$true] %s1275_s15 }
 0x29a   : > { %v696_v49 = vpop.xlane.xlu0 %695 }
 0x29b   : > { %v583_v50 = vpop.xlane.xlu1 %582  ;;  %1566 = vrcp.f32 %v696_v49 }
 0x29c   : > { %1568 = vrcp.f32 %v583_v50 }
 0x2a1   : > { %v1567_v51 = vpop.eup %1566 }
 0x2a2   : > { %v1569_v52 = vpop.eup %1568  ;;  %v702_v53 = vmul.f32 %v1567_v51, %v1962_v6 }
 0x2a3   : > { %v589_v54 = vmul.f32 %v1569_v52, %v1964_v7 }
 0x2a4   : > { %v704_v55 = vpack.c.bf16 %v702_v53, %v702_v53 }
 0x2a5   : > { %v591_v56 = vpack.c.bf16 %v589_v54, %v589_v54 }
 0x2a6   : > { %1388 = vmatmul.msk.bf16.vlgmr.msrb.gmra.mxu2 %vm525_vm1, %v704_v55 }
 0x2a7   : > { %1384 = vmatmul.msk.bf16.vlgmr.msra.gmra.mxu3 %vm525_vm1, %v591_v56 }
 0x2a8   : > { %742 = vmatpush.bf16.msra.mxu3 %v733_v57 }
 0x2a9   : > { %v586_v10 = vpop.xlane.xlu0 %585 }
 0x2aa   : > { %1570 = vrcp.f32 %v586_v10 }
 0x2ab   : > { %v699_v15 = vpop.xlane.xlu2 %698 }
 0x2ac   : > { %1572 = vrcp.f32 %v699_v15 }
 0x2b0   : > { %v1571_v58 = vpop.eup %1570 }
 0x2b1   : > { %v590_v59 = vmul.f32 %v1571_v58, %v1971_v21 }
 0x2b2   : > { %v1573_v1 = vpop.eup %1572 }
 0x2b3   : > { %v819_v60 = vpop.permute.xlu2 %818  ;;  %v840_v62 = vpop.permute.xlu1 %839  ;;  %v592_v63 = vpack.c.bf16 %v590_v59, %v590_v59  ;;  %v703_v4 = vmul.f32 %v1573_v1, %v1976_v24 }
 0x2b4   : > { %v824_v61 = vsel %vm598_vm2, %v819_v60, 0  ;;  %v845_v0 = vsel %vm598_vm2, %v840_v62, 0 }
 0x2b5   : > { %833 = vmatpush.bf16.msra.mxu2 %v824_v61  ;;  %v705_v5 = vpack.c.bf16 %v703_v4, %v703_v4 }
 0x2b7   : > { %1385 = vmatmul.msk.bf16.vlgmr.msrb.gmra.mxu3 %vm525_vm1, %v592_v63  ;;  %v1543_v63 = vld [vmem:[%s2110_s4] ss:$0 sm:$0xff] }
 0x2b8   : > { %854 = vmatpush.bf16.msrb.mxu3 %v845_v0 }
 0x2c7   : > { %1389 = vmatmul.msk.bf16.vlgmr.msra.gmra.mxu3 %vm525_vm1, %v705_v5 }
 0x2e7   : > { %v811_v6 = vpop.xlane.xlu0 %810 }
 0x2e8   : > { %1574 = vrcp.f32 %v811_v6 }
 0x2ec   : > { %v808_v7 = vpop.xlane.xlu1 %807  ;;  %v923_v14 = vpop.xlane.xlu2 %922 }
 0x2ed   : > { %1576 = vrcp.f32 %v808_v7 }
 0x2ee   : > { %v1575_v8 = vpop.eup %1574  ;;  %1578 = vrcp.f32 %v923_v14 }
 0x2ef   : > { %v815_v9 = vmul.f32 %v1575_v8, %v1559_v40  ;;  %v920_v17 = vpop.xlane.xlu0 %919 }
 0x2f0   : > { %1580 = vrcp.f32 %v920_v17 }
 0x2f1   : > { %v817_v11 = vpack.c.bf16 %v815_v9, %v815_v9 }
 0x2f3   : > { %1393 = vmatmul.msk.bf16.vlgmr.msrb.gmra.mxu3 %vm525_vm1, %v817_v11  ;;  %v1577_v12 = vpop.eup %1576  ;;  %v1742_v11 = vmov 32.0  }
 0x2f4   : > { %v814_v13 = vmul.f32 %v1577_v12, %v1563_v44  ;;  %v1579_v18 = vpop.eup %1578  ;;  %1582 = vrcp.f32 %v1742_v11 }
 0x2f5   : > { %v927_v21 = vmul.f32 %v1579_v18, %v1987_v43 }
 0x2f6   : > { %v816_v16 = vpack.c.bf16 %v814_v13, %v814_v13  ;;  %v1581_v19 = vpop.eup %1580 }
 0x2f7   : > { %v926_v22 = vmul.f32 %v1581_v19, %v1565_v47  ;;  %v929_v26 = vpack.c.bf16 %v927_v21, %v927_v21  ;;  %v1441_v47 = vld [vmem:[#allocation2 + $0x8] sm:$0xff] }
 0x2f8   : > { %1392 = vmatmul.msk.bf16.vlgmr.msra.gmra.mxu2 %vm525_vm1, %v816_v16  ;;  %1034 = vmatpush.bf16.msra.mxu0 %v1441_v47  ;;  %v1544_v47 = vld [vmem:[%s2111_s5] ss:$0 sm:$0xff] }
 0x2f9   : > { %v928_v27 = vpack.c.bf16 %v926_v22, %v926_v22 }
 0x2fa   : > { %v1583_v12 = vpop.eup %1582 }
 0x2fb   : > { %v1051_v13 = vmul.f32 32.0, %v1583_v12  ;;  %vm1055_vm5 = vweird.f32 %v1583_v12 }
 0x2fc   : > { %1035 = vmatpush.bf16.msra.mxu0 %v1440_v48 }
 0x2fd   : > { %v1052_v14 = vsub.f32 1.0, %v1051_v13 }
 0x2ff   : > { %v1053_v16 = vmul.f32 %v1583_v12, %v1052_v14 }
 0x301   : > { %v1054_v17 = vadd.f32 %v1583_v12, %v1053_v16 }
 0x302   : > { %v931_v20 = vpop.permute.xlu0 %930 }
 0x303   : > { %v936_v23 = vsel %vm598_vm2, %v931_v20, 0  ;;  %v2024_v18 = vsel %vm1055_vm5, %v1583_v12, %v1054_v17 }
 0x304   : > { %v952_v24 = vpop.permute.xlu1 %951  ;;  %945 = vmatpush.bf16.msrb.mxu2 %v936_v23 }
 0x305   : > { %v957_v25 = vsel %vm598_vm2, %v952_v24, 0 }
 0x306   : > { %966 = vmatpush.bf16.msra.mxu3 %v957_v25 }
 0x308   : > { %1396 = vmatmul.msk.bf16.vlgmr.msrb.gmra.mxu2 %vm525_vm1, %v928_v27  ;;  %v1443_v27 = vld [vmem:[#allocation5 + $0x8] sm:$0xff] }
 0x309   : > { %1397 = vmatmul.msk.bf16.vlgmr.msra.gmra.mxu3 %vm525_vm1, %v929_v26  ;;  %1137 = vmatpush.bf16.msra.mxu1 %v1443_v27 }
 0x329   : > { %v723_v28 = vpop.f32.mrf.mxu2 }
 0x32a   : > { %v611_v29 = vpop.f32.mrf.mxu3 }
 0x331   : > { %v725_v30 = vpop.f32.mrf.mxu2 }
 0x332   : > { %v613_v31 = vpop.f32.mrf.mxu3 }
 0x333   : > { %v1442_v31 = vld [vmem:[#allocation5] sm:$0xff] }
 0x334   : > { %1138 = vmatpush.bf16.msra.mxu1 %v1442_v31 }
 0x33a   : > { %v632_v32 = vpop.f32.mrf.mxu3 }
 0x342   : > { %v634_v33 = vpop.f32.mrf.mxu3 }
 0x34a   : > { %v744_v34 = vpop.f32.mrf.mxu3 }
 0x34b   : > { %v1527_v35 = vpack.i.bf16 %v744_v34, %v723_v28 }
 0x34d   : > { %1528 = vrot.lane.b32.xlu0 %v1527_v35, %s1739_s16 }
 0x352   : > { %v746_v36 = vpop.f32.mrf.mxu3 }
 0x376   : > { %v856_v37 = vpop.f32.mrf.mxu3 }
 0x37b   : > { %v835_v38 = vpop.f32.mrf.mxu2 }
 0x37c   : > { %v1532_v39 = vpack.i.bf16 %v856_v37, %v835_v38 }
 0x37e   : > { %v858_v40 = vpop.f32.mrf.mxu3  ;;  %1533 = vrot.lane.b32.xlu1 %v1532_v39, %s1740_s21  ;;  %s1277_s21 = sshll.u32 %s1274_s24, 4  ;;  %s1278_s21 = int_to_ptr.hbm [resolvable:$true] %s1277_s21 }
 0x383   : > { %v837_v41 = vpop.f32.mrf.mxu2 }
 0x38b   : > { %v947_v42 = vpop.f32.mrf.mxu2 }
 0x38c   : > { %v968_v43 = vpop.f32.mrf.mxu3 }
 0x38d   : > { %v1537_v44 = vpack.i.bf16 %v968_v43, %v947_v42 }
 0x38f   : > { %1538 = vrot.lane.b32.xlu0 %v1537_v44, %s1741_s22  ;;  %s1666_s22 = sshra.s32 %s1278_s21, 4  ;;  %s1667_s22 = int_to_ptr.hbm [resolvable:$true] %s1666_s22 }
 0x390   : > { %s1668_s27 = scalar_lea.hbm %s1667_s22, 16  ;;  %p1673_p3 = scmp.lt.s32.totalorder %s1667_s22, %s2119_s13 }
 0x391   : > { %p1669_p0 = scmp.ne.s32.totalorder %s1667_s22, %s1668_s27  ;;  %p1674_p4 = scmp.lt.s32.totalorder %s1672_s20, %s1668_s27 }
 0x393   : > { %v949_v45 = vpop.f32.mrf.mxu2  ;;  %p1670_p1 = pnand %p1669_p0, %p1852_p5  ;;  %p1675_p7 = por %p1674_p4, %p1673_p3 }
 0x394   : > { %v970_v46 = vpop.f32.mrf.mxu3 }
 0x395   : > { %p1671_p2 = pneg %p1670_p1 }
 0x397   : > { %p1676_p8 = pnand %p1675_p7, %p1671_p2 }
 0x3bf   : > { %v1529_v49 = vpop.permute.xlu0 %1528 }
 0x3c0   : > { %v1531_v51 = vunpack.i.h.bf16 %v1529_v49  ;;  %v1530_v52 = vunpack.i.l.bf16 %v1529_v49 }
 0x3c2   : > { %v997_v56 = vsel %vm525_vm1, %v632_v32, %v1531_v51  ;;  %v996_v57 = vsel %vm525_vm1, %v611_v29, %v1530_v52  ;;  %v1545_v51 = vld [vmem:[%s2112_s6] ss:$0 sm:$0xff] }
 0x3f0   : > { %v1534_v50 = vpop.permute.xlu1 %1533 }
 0x3f1   : > { %v1536_v53 = vunpack.i.h.bf16 %v1534_v50  ;;  %v1535_v54 = vunpack.i.l.bf16 %v1534_v50 }
 0x3f3   : > { %v999_v58 = vsel %vm998_vm3, %v996_v57, %v1535_v54  ;;  %v1000_v59 = vsel %vm998_vm3, %v997_v56, %v1536_v53 }
 0x401   : > { %v1539_v55 = vpop.permute.xlu0 %1538 }
 0x402   : > { %v1541_v10 = vunpack.i.h.bf16 %v1539_v55  ;;  %v1540_v15 = vunpack.i.l.bf16 %v1539_v55 }
 0x404   : > { %v1002_v60 = vsel %vm1001_vm4, %v999_v58, %v1540_v15  ;;  %v1003_v61 = vsel %vm1001_vm4, %v1000_v59, %v1541_v10  ;;  %v1447_v10 = vld [vmem:[%s2115_s9 + $0x18] sm:$0xff]  ;;  %v1446_v15 = vld [vmem:[%s2115_s9 + $0x10] sm:$0xff]  ;;  %v1445_v58 = vld [vmem:[%s2115_s9 + $0x8] sm:$0xff] }
 0x405   : > { %v1004_v62 = vpack.c.bf16 %v1003_v61, %v1002_v60  ;;  %1192 = vmatpush.bf16.msra.mxu2 %v1447_v10  ;;  %v1444_v59 = vld [vmem:[%s2115_s9] sm:$0xff] }
 0x406   : > { %v1546_v61 = vld [vmem:[%s2114_s8] ss:$0 sm:$0xff] }
 0x407   : > { %1406 = vmatmul.msk.bf16.vlgmr.msra.gmra.mxu0 %vm500_vm0, %v1004_v62 }
 0x409   : > { %1193 = vmatpush.bf16.msra.mxu2 %v1446_v15 }
 0x40d   : > { %1194 = vmatpush.bf16.msra.mxu2 %v1445_v58 }
 0x411   : > { %1195 = vmatpush.bf16.msra.mxu2 %v1444_v59 }
 0x484   : > { %v1037_v0 = vpop.f32.mrf.mxu0 }
 0x485   : > { %v1038_v1 = vadd.f32 %v1543_v63, %v1037_v0 }
 0x487   : > { %v1042_v4 = vadd.f32 %v1038_v1, %v1897_v2 }
 0x489   : > { %v1044_v5 = vsel %vm500_vm0, %v1042_v4, 0.0 }
 0x48a   : > { %1045 = vadd.xlane.f32.xlu1 %v1044_v5 }
 0x48c   : > { %v1039_v6 = vpop.f32.mrf.mxu0 }
 0x48d   : > { %v1040_v7 = vadd.f32 %v1543_v63, %v1039_v6  ;;  %v1547_v6 = vld [vmem:[%s2116_s10] ss:$0 sm:$0xff] }
 0x48f   : > { %v1043_v8 = vadd.f32 %v1040_v7, %v1899_v3 }
 0x491   : > { %v1047_v9 = vsel %vm500_vm0, %v1043_v8, 0.0 }
 0x492   : > { %1048 = vadd.xlane.f32.xlu2 %v1047_v9 }
 0x4fd   : > { %v1046_v2 = vpop.xlane.xlu1 %1045 }
 0x4fe   : > { %v1057_v19 = vmul.f32 %v2024_v18, %v1046_v2 }
 0x500   : > { %v1059_v20 = vsub.f32 %v1042_v4, %v1057_v19 }
 0x502   : > { %v1061_v21 = vmul.f32 %v1059_v20, %v1059_v20 }
 0x504   : > { %v1063_v3 = vsel %vm500_vm0, %v1061_v21, 0.0 }
 0x505   : > { %v1049_v22 = vpop.xlane.xlu2 %1048  ;;  %1064 = vadd.xlane.f32.xlu0 %v1063_v3 }
 0x506   : > { %v1058_v23 = vmul.f32 %v2024_v18, %v1049_v22 }
 0x508   : > { %v1060_v24 = vsub.f32 %v1043_v8, %v1058_v23 }
 0x50a   : > { %v1062_v25 = vmul.f32 %v1060_v24, %v1060_v24 }
 0x50c   : > { %v1066_v26 = vsel %vm500_vm0, %v1062_v25, 0.0 }
 0x50d   : > { %1067 = vadd.xlane.f32.xlu2 %v1066_v26 }
 0x578   : > { %v1065_v28 = vpop.xlane.xlu0 %1064 }
 0x579   : > { %v1069_v29 = vmul.f32 %v1065_v28, %v2024_v18 }
 0x57b   : > { %v1071_v30 = vadd.f32 1e-06, %v1069_v29 }
 0x57d   : > { %1584 = vrsqrt.f32 %v1071_v30  ;;  %vm1079_vm7 = vweird.f32 %v1071_v30 }
 0x580   : > { %v1068_v32 = vpop.xlane.xlu2 %1067 }
 0x581   : > { %v1070_v33 = vmul.f32 %v1068_v32, %v2024_v18 }
 0x583   : > { %v1585_v34 = vpop.eup %1584  ;;  %v1072_v35 = vadd.f32 1e-06, %v1070_v33 }
 0x584   : > { %v1074_v36 = vmul.f32 %v1585_v34, %v1071_v30  ;;  %vm1080_vm6 = vweird.f32 %v1585_v34 }
 0x585   : > { %1586 = vrsqrt.f32 %v1072_v35  ;;  %vm1081_vm8 = vmor %vm1079_vm7, %vm1080_vm6  ;;  %vm1089_vm10 = vweird.f32 %v1072_v35 }
 0x586   : > { %v1075_v37 = vmul.f32 %v1585_v34, %v1074_v36 }
 0x588   : > { %v1076_v38 = vmul.f32 0.5, %v1075_v37 }
 0x58a   : > { %v1077_v39 = vsub.f32 1.5, %v1076_v38 }
 0x58b   : > { %v1587_v40 = vpop.eup %1586 }
 0x58c   : > { %v1078_v41 = vmul.f32 %v1585_v34, %v1077_v39  ;;  %v1084_v42 = vmul.f32 %v1587_v40, %v1072_v35  ;;  %vm1090_vm9 = vweird.f32 %v1587_v40 }
 0x58d   : > { %vm1091_vm11 = vmor %vm1089_vm10, %vm1090_vm9 }
 0x58e   : > { %v1085_v43 = vmul.f32 %v1587_v40, %v1084_v42  ;;  %v1082_v44 = vsel %vm1081_vm8, %v1585_v34, %v1078_v41  ;;  %v1549_v42 = vld [vmem:[%s2118_s12] ss:$0 sm:$0xff] }
 0x58f   : > { %v1093_v48 = vmul.f32 %v1082_v44, %v1059_v20 }
 0x590   : > { %v1086_v45 = vmul.f32 0.5, %v1085_v43 }
 0x591   : > { %v1099_v52 = vmul.f32 %v1544_v47, %v1093_v48 }
 0x592   : > { %v1087_v46 = vsub.f32 1.5, %v1086_v45 }
 0x593   : > { %v1105_v55 = vadd.f32 %v1545_v51, %v1099_v52 }
 0x594   : > { %v1088_v49 = vmul.f32 %v1587_v40, %v1087_v46 }
 0x596   : > { %v1092_v50 = vsel %vm1091_vm11, %v1587_v40, %v1088_v49  ;;  %v1548_v40 = vld [vmem:[%s2117_s11] ss:$0 sm:$0xff] }
 0x597   : > { %v1094_v53 = vmul.f32 %v1092_v50, %v1060_v24 }
 0x599   : > { %v1100_v54 = vmul.f32 %v1544_v47, %v1094_v53 }
 0x59b   : > { %v1106_v56 = vadd.f32 %v1545_v51, %v1100_v54 }
 0x59d   : > { %v1107_v57 = vpack.c.bf16 %v1106_v56, %v1105_v55 }
 0x59f   : > { %1415 = vmatmul.msk.bf16.vlgmr.msra.gmra.mxu1 %vm500_vm0, %v1107_v57 }
 0x61c   : > { %v1140_v60 = vpop.f32.mrf.mxu1 }
 0x61d   : > { %v1141_v62 = vadd.f32 %v1546_v61, %v1140_v60 }
 0x61f   : > { %v1145_v1 = vmax.f32 %v1141_v62, 0.0 }
 0x624   : > { %v1142_v63 = vpop.f32.mrf.mxu1 }
 0x625   : > { %v1143_v0 = vadd.f32 %v1546_v61, %v1142_v63 }
 0x627   : > { %v1146_v4 = vmax.f32 %v1143_v0, 0.0 }
 0x629   : > { %v1147_v5 = vpack.c.bf16 %v1146_v4, %v1145_v1 }
 0x62b   : > { %1432 = vmatmul.msk.bf16.vlgmr.msra.gmra.mxu2 %vm1184_vm12, %v1147_v5 }
 0x6ae   : > { %v1197_v7 = vpop.f32.mrf.mxu2 }
 0x6af   : > { %v1198_v8 = vadd.f32 %v1547_v6, %v1197_v7 }
 0x6b1   : > { %v1202_v9 = vadd.f32 %v1198_v8, %v1105_v55 }
 0x6b3   : > { %v1204_v11 = vsel %vm500_vm0, %v1202_v9, 0.0 }
 0x6b4   : > { %1205 = vadd.xlane.f32.xlu2 %v1204_v11 }
 0x6b6   : > { %v1199_v12 = vpop.f32.mrf.mxu2 }
 0x6b7   : > { %v1200_v13 = vadd.f32 %v1547_v6, %v1199_v12 }
 0x6b9   : > { %v1203_v14 = vadd.f32 %v1200_v13, %v1106_v56 }
 0x6bb   : > { %v1207_v16 = vsel %vm500_vm0, %v1203_v14, 0.0 }
 0x6bc   : > { %1208 = vadd.xlane.f32.xlu2 %v1207_v16 }
 0x727   : > { %v1206_v17 = vpop.xlane.xlu2 %1205 }
 0x728   : > { %v1210_v2 = vmul.f32 %v1206_v17, %v2024_v18 }
 0x72a   : > { %v1212_v19 = vsub.f32 %v1202_v9, %v1210_v2 }
 0x72c   : > { %v1214_v20 = vmul.f32 %v1212_v19, %v1212_v19 }
 0x72e   : > { %v1216_v21 = vsel %vm500_vm0, %v1214_v20, 0.0 }
 0x72f   : > { %1217 = vadd.xlane.f32.xlu2 %v1216_v21  ;;  %v1209_v3 = vpop.xlane.xlu2 %1208 }
 0x730   : > { %v1211_v22 = vmul.f32 %v1209_v3, %v2024_v18 }
 0x732   : > { %v1213_v23 = vsub.f32 %v1203_v14, %v1211_v22 }
 0x734   : > { %v1215_v24 = vmul.f32 %v1213_v23, %v1213_v23 }
 0x736   : > { %v1219_v25 = vsel %vm500_vm0, %v1215_v24, 0.0 }
 0x737   : > { %1220 = vadd.xlane.f32.xlu1 %v1219_v25 }
 0x7a2   : > { %v1218_v26 = vpop.xlane.xlu2 %1217 }
 0x7a3   : > { %v1222_v27 = vmul.f32 %v1218_v26, %v2024_v18 }
 0x7a5   : > { %v1224_v28 = vadd.f32 1e-06, %v1222_v27 }
 0x7a7   : > { %1588 = vrsqrt.f32 %v1224_v28  ;;  %vm1232_vm14 = vweird.f32 %v1224_v28 }
 0x7aa   : > { %v1221_v29 = vpop.xlane.xlu1 %1220 }
 0x7ab   : > { %v1223_v30 = vmul.f32 %v1221_v29, %v2024_v18 }
 0x7ad   : > { %v1589_v31 = vpop.eup %1588  ;;  %v1225_v32 = vadd.f32 1e-06, %v1223_v30 }
 0x7ae   : > { %v1227_v33 = vmul.f32 %v1589_v31, %v1224_v28  ;;  %vm1233_vm13 = vweird.f32 %v1589_v31 }
 0x7af   : > { %1590 = vrsqrt.f32 %v1225_v32  ;;  %vm1234_vm15 = vmor %vm1232_vm14, %vm1233_vm13  ;;  %vm1242_vm2 = vweird.f32 %v1225_v32 }
 0x7b0   : > { %v1228_v34 = vmul.f32 %v1589_v31, %v1227_v33 }
 0x7b2   : > { %v1229_v35 = vmul.f32 0.5, %v1228_v34 }
 0x7b4   : > { %v1230_v36 = vsub.f32 1.5, %v1229_v35 }
 0x7b5   : > { %v1591_v37 = vpop.eup %1590 }
 0x7b6   : > { %v1231_v38 = vmul.f32 %v1589_v31, %v1230_v36  ;;  %v1237_v39 = vmul.f32 %v1591_v37, %v1225_v32  ;;  %vm1243_vm1 = vweird.f32 %v1591_v37 }
 0x7b7   : > { %vm1244_vm3 = vmor %vm1242_vm2, %vm1243_vm1 }
 0x7b8   : > { %v1235_v18 = vsel %vm1234_vm15, %v1589_v31, %v1231_v38  ;;  %v1238_v41 = vmul.f32 %v1591_v37, %v1237_v39 }
 0x7b9   : > { %v1246_v43 = vmul.f32 %v1235_v18, %v1212_v19 }
 0x7ba   : > { %v1239_v44 = vmul.f32 0.5, %v1238_v41 }
 0x7bb   : > { %v1252_v45 = vmul.f32 %v1548_v40, %v1246_v43 }
 0x7bc   : > { %v1240_v46 = vsub.f32 1.5, %v1239_v44 }
 0x7bd   : > { %v1258_v47 = vadd.f32 %v1549_v42, %v1252_v45 }
 0x7be   : > { %v1241_v48 = vmul.f32 %v1591_v37, %v1240_v46 }
 0x7bf   : > { %1260 = vst.msk [vmem:[%s468_s19] sm:$0xff] %vm500_vm0, %v1258_v47 }
 0x7c0   : > { %v1245_v49 = vsel %vm1244_vm3, %v1591_v37, %v1241_v48 }
 0x7c1   : > { %v1247_v50 = vmul.f32 %v1245_v49, %v1213_v23 }
 0x7c3   : > { %v1253_v51 = vmul.f32 %v1548_v40, %v1247_v50 }
 0x7c5   : > { %v1259_v52 = vadd.f32 %v1549_v42, %v1253_v51 }
 0x7c7   : > { %1261 = vst.msk [vmem:[%s468_s19 + $0x8] sm:$0xff] %vm500_vm0, %v1259_v52 }
 0x7c8   : > { %1679 = shalt.err (!%p1676_p8)
}
 0x7c9   : > { %s1743_s30 = smov 128  }
 0x7ca   : > { %1457 = dma.vmem_to_hbm [thread:$0]  (%p1852_p5), %s1276_s15, 256, %s1278_s21, %s1263_s29, %s1743_s30, %s1743_s30, %s1739_s16  }
 0x7cb PF: > { %p1474_p9 = scmp.ge.s32.totalorder %s1722_s28, 2  ;;  %s1292_s14 = sand.u32 1, %s1710_s25  }
 0x7cc   : > { %s1293_s17 = scalar_lea.sflag [#allocation4], %s1292_s14 }
 0x7cd   : > { %p1467_p10 = pnand %p1474_p9, %p1856_p6 }
 0x7cf   : > { %p1468_p11 = pneg %p1467_p10 }
 0x7d1   : > { %1705 = dma.done.wait (%p1468_p11), %s1293_s17, 256  }
 0x7d2   : > { %1707 = vsyncadd (%p1468_p11), %s1293_s17, 4294967040  ;;  %s2132_s28 = sld [smem:[#allocation12_spill]]  ;;  %s2135_s25 = smov %s1714_s26 }
 0x7d3   : > { %s2133_s22 = sld [smem:[#allocation11_spill]] }
 0x7d4   : > { %s2134_s27 = sld [smem:[#allocation13_spill]] }
 0x7d8   : > { %p25_p12 = scmp.ge.s32.totalorder %s2132_s28, 4  }
 0x7d9   : > { %s2136_s26 = smov %s2133_s22 }
 0x7da   :  { %27 = sbr.rel (!%p25_p12) target bundleno = 5 (0x5), region = 116 }
 0x7df   :  { %1299 = vsyncpa [#allocation3], 1 }
 0x7e0   :  { %1301 = vsyncpa [#allocation3 + $0x1], 1 }
 0x7e1   :  { %1302 = vsyncpa [#allocation6], 1 }
 0x7e2   :  { %1303 = vsyncpa [#allocation4], 1 }
 0x7e3   :  { %1305 = vsyncpa [#allocation4 + $0x1], 1 }

// kernel: tpu_custom_call.1
= control target key start
LH: loop header
LB: loop body
LE: loop exit
PB: predicated region body
PF: predicated region fallthrough
CT: control target
= control target key end

     0   :  { %18 = vsyncpa [#allocation3], 0  ;;  %s2106_s0 = inlined_call_operand.vmem [shape: f32[4,8,32], index: 0, kind: input, shape index: {}]   ;;  %s2107_s1 = inlined_call_operand.vmem [shape: bf16[32,96], index: 1, kind: input, shape index: {}]   ;;  %s2108_s2 = inlined_call_operand.vmem [shape: f32[1,96], index: 2, kind: input, shape index: {}]   ;;  %s2109_s3 = inlined_call_operand.hbm [shape: bf16[32,32], index: 3, kind: input, shape index: {}]   ;;  %s2110_s4 = inlined_call_operand.vmem [shape: f32[1,32], index: 4, kind: input, shape index: {}]   ;;  %s2111_s5 = inlined_call_operand.vmem [shape: f32[1,32], index: 5, kind: input, shape index: {}]   ;;  %s2112_s6 = inlined_call_operand.vmem [shape: f32[1,32], index: 6, kind: input, shape index: {}]   ;;  %s2113_s7 = inlined_call_operand.hbm [shape: bf16[32,64], index: 7, kind: input, shape index: {}]   ;;  %s2114_s8 = inlined_call_operand.vmem [shape: f32[1,64], index: 8, kind: input, shape index: {}]   ;;  %s2115_s9 = inlined_call_operand.vmem [shape: bf16[64,32], index: 9, kind: input, shape index: {}]   ;;  %s2116_s10 = inlined_call_operand.vmem [shape: f32[1,32], index: 10, kind: input, shape index: {}]   ;;  %s2117_s11 = inlined_call_operand.vmem [shape: f32[1,32], index: 11, kind: input, shape index: {}]   ;;  %s2118_s12 = inlined_call_operand.vmem [shape: f32[1,32], index: 12, kind: input, shape index: {}]   ;;  %s2119_s13 = inlined_call_operand.hbm [shape: f32[4,8,32], index: 13, kind: output, shape index: {}]  }
   0x1   :  { %19 = vsyncpa [#allocation6], 0 }
   0x2   :  { %20 = vsyncpa [#allocation4], 0 }
   0x3   :  { %22 = vsyncpa [#allocation4 + $0x1], 0  ;;  %s1814_s25 = smov 0   ;;  %s1816_s26 = smov 0  }
   0x4   :  { %s1818_s27 = smov 0   ;;  %s1820_s28 = smov 0  }
   0x5 LB: > { %2124 = sst [smem:[#allocation11_spill]] %s1718_s27  ;;  %s1835_s29 = sadd.s32 4294967295, %s1722_s28   ;;  %s1722_s28 = sphi %s1820_s28, %s2132_s28   ;;  %s1718_s27 = sphi %s1818_s27, %s2134_s27   ;;  %s1714_s26 = sphi %s1816_s26, %s2136_s26   ;;  %s1710_s25 = sphi %s1814_s25, %s2135_s25  }
   0x6   : > { %s1362_s30 = sadd.s32 4294967294, %s1722_s28   ;;  %s1839_s14 = sadd.s32 1, %s1722_s28  }
   0x7   : > { %2125 = sst [smem:[#allocation12_spill]] %s1839_s14  ;;  %s313_s15 = sadd.s32 1, %s1718_s27 }
   0x8   : > { %s310_s16 = ssub.s32 %s1722_s28, %s1839_s14  ;;  %p323_p0 = scmp.ne.s32.totalorder %s1718_s27, %s1714_s26 }
   0x9   : > { %p311_p1 = scmp.eq.s32.totalorder %s310_s16, 0  ;;  %p324_p2 = scmp.eq.s32.totalorder %s1835_s29, 1 }
   0xa   : > { %p329_p3 = scmp.ne.s32.totalorder %s1714_s26, %s1710_s25  ;;  %p330_p4 = scmp.eq.s32.totalorder %s1362_s30, 1 }
   0xb   : > { %s1850_s17 = scalar_select %p311_p1, %s1718_s27, %s313_s15  }
   0xc   : > { %p1852_p5 = por %p324_p2, %p323_p0  ;;  %p1856_p6 = por %p330_p4, %p329_p3 }
   0xd   : > { %2126 = sst [smem:[#allocation13_spill]] %s1850_s17  ;;  %p1363_p7 = scmp.ge.s32.totalorder %s1722_s28, 1 }
   0xe   : > { %s2128_s19 = scalar_select %p1856_p6, 1, 0 }
   0xf   : > { %p337_p8 = scmp.lt.s32.totalorder %s1722_s28, 3  ;;  %p1470_p9 = scmp.eq.s32.totalorder %s1835_s29, 0 }
  0x10   : > { %2129 = sst [smem:[#allocation14_spill]] %s2128_s19  ;;  %s354_s23 = sshll.u32 %s2109_s3, 4  ;;  %s355_s23 = int_to_ptr.hbm [resolvable:$true] %s354_s23 }
  0x11   : > { %p1863_p10 = pnand %p1363_p7, %p337_p8  ;;  %s1724_s24 = smov [#allocation2]  }
  0x12   : > { %s356_s30 = sshll.u32 %s1724_s24, 4  ;;  %s377_s17 = sshll.u32 %s2113_s7, 4  ;;  %s357_s30 = int_to_ptr.vmem [resolvable:$true] %s356_s30  ;;  %s378_s17 = int_to_ptr.hbm [resolvable:$true] %s377_s17 }
  0x13   : > { %p1459_p11 = pneg %p1863_p10  ;;  %s1725_s27 = smov 64  }
  0x14   : > { %s1726_s14 = smov 4   ;;  %s1727_s19 = smov [#allocation5]  }
  0x15   : > { %p1460_p12 = pnand %p1470_p9, %p1459_p11  ;;  %s379_s21 = sshll.u32 %s1727_s19, 4  ;;  %s380_s21 = int_to_ptr.vmem [resolvable:$true] %s379_s21 }
  0x16   : > { %419 = sbr.rel (%p1863_p10) target bundleno = 1995 (0x7cb), region = 72 }
  0x17   : > { %1462 = dma.hbm_to_vmem [thread:$0]  (!%p1460_p12), %s355_s23, 256, %s357_s30, [#allocation3], %s1725_s27, %s1725_s27, %s1726_s14  }
  0x18   : > { %1465 = dma.hbm_to_vmem [thread:$0]  (!%p1460_p12), %s378_s17, 256, %s380_s21, [#allocation6], %s1725_s27, %s1725_s27, %s1726_s14  }
  0x1b   : > { %1697 = dma.done.wait (%p1470_p9), [#allocation3], 256  }
  0x1c   : > { %1699 = vsyncadd (%p1470_p9), [#allocation3], 4294967040 }
  0x1d   : > { %1701 = dma.done.wait (%p1470_p9), [#allocation6], 256  }
  0x1e   : > { %1703 = vsyncadd (%p1470_p9), [#allocation6], 4294967040  ;;  %s1371_s22 = sshll.u32 %s1835_s29, 1  ;;  %v1439_v0 = vld [vmem:[%s2107_s1 + $0x8] sm:$0xff]  ;;  %v1438_v1 = vld [vmem:[%s2107_s1] sm:$0xff]  ;;  %vm500_vm0 = vcmask 261120  }
  0x1f   : > { %p470_p13 = scmp.lt.s32.totalorder %s1371_s22, 3  ;;  %510 = vmatpush.bf16.msra.mxu0 %v1439_v0  ;;  %v1542_v5 = vld [vmem:[%s2108_s2] ss:$0 sm:$0xff]  ;;  %s1728_s21 = smov 120   ;;  %vm525_vm1 = vcmask 64512   ;;  %vm598_vm2 = vcmask 1043456  }
  0x20   : > { %s1731_s14 = smov 112   ;;  %s1732_s17 = smov 80   ;;  %vm998_vm3 = vcmask 130048   ;;  %vm1001_vm4 = vcmask 195584   ;;  %vm1184_vm12 = vcmask 523264  }
  0x21   : > { %s2138_s22 = smov (!%p470_p13, %s1371_s22), 3  ;;  %s1734_s20 = smov 104  }
  0x22   : > { %s1372_s27 = sshll.u32 %s2138_s22, 3  ;;  %s1729_s22 = smov 88  }
  0x23   : > { %s473_s19 = scalar_lea.vmem %s2106_s0, %s1372_s27  ;;  %511 = vmatpush.bf16.msra.mxu0 %v1438_v1  ;;  %s1730_s27 = smov 96  }
  0x24   : > { %v1897_v2 = vld [vmem:[%s473_s19] sm:$0xff]  ;;  %v1899_v3 = vld [vmem:[%s473_s19 + $0x8] sm:$0xff]  ;;  %s1733_s19 = smov 72   ;;  %s1735_s23 = smov 64  }
  0x25   : > { %v479_v4 = vpack.c.bf16 %v1899_v3, %v1897_v2  ;;  %s1736_s24 = smov 56   ;;  %s1737_s30 = smov 48  }
  0x26   : > { %s1738_s15 = smov 40   ;;  %s1739_s16 = smov 8  }
  0x27   : > { %1381 = vmatmul.msk.bf16.vlgmr.msra.gmra.mxu0 %vm500_vm0, %v479_v4 }
  0xa4   : > { %v513_v6 = vpop.f32.mrf.mxu0 }
  0xa5   : > { %v514_v7 = vadd.f32 %v1542_v5, %v513_v6 }
  0xa7   : > { %v518_v8 = vpack.c.bf16 %v514_v7, %v514_v7 }
  0xa9   : > { %v521_v9 = vunpack.c.l.b16 %v518_v8 }
  0xab   : > { %v1907_v10 = vpack.c.b16 %v521_v9, %v521_v9 }
  0xac   : > { %v515_v11 = vpop.f32.mrf.mxu0 }
  0xad   : > { %v516_v12 = vadd.f32 %v1542_v5, %v515_v11  ;;  %636 = vrot.lane.b32.xlu2 %v1907_v10, %s1728_s21  ;;  %638 = vrot.lane.b32.xlu1 %v1907_v10, %s1729_s22 }
  0xae   : > { %523 = vrot.lane.b32.xlu0 %v1907_v10, %s1730_s27 }
  0xaf   : > { %v519_v13 = vpack.c.bf16 %v516_v12, %v516_v12 }
  0xb1   : > { %v546_v14 = vunpack.c.l.b16 %v519_v13 }
  0xb3   : > { %v1912_v15 = vpack.c.b16 %v546_v14, %v546_v14 }
  0xb5   : > { %659 = vrot.lane.b32.xlu2 %v1912_v15, %s1728_s21  ;;  %661 = vrot.lane.b32.xlu1 %v1912_v15, %s1729_s22  ;;  %s1740_s21 = smov 16   ;;  %s1741_s22 = smov 24  }
  0xb6   : > { %548 = vrot.lane.b32.xlu0 %v1912_v15, %s1730_s27 }
  0xbd   : > { %748 = vrot.lane.b32.xlu2 %v1907_v10, %s1731_s14  ;;  %773 = vrot.lane.b32.xlu1 %v1912_v15, %s1732_s17 }
  0xbe   : > { %750 = vrot.lane.b32.xlu0 %v1907_v10, %s1732_s17  ;;  %s1448_s17 = sshll.u32 %s1835_s29, 4 }
  0xc5   : > { %885 = vrot.lane.b32.xlu2 %v1912_v15, %s1733_s19  ;;  %862 = vrot.lane.b32.xlu1 %v1907_v10, %s1733_s19 }
  0xc6   : > { %771 = vrot.lane.b32.xlu0 %v1912_v15, %s1731_s14 }
  0xcd   : > { %883 = vrot.lane.b32.xlu1 %v1912_v15, %s1734_s20 }
  0xce   : > { %860 = vrot.lane.b32.xlu0 %v1907_v10, %s1734_s20  ;;  %s1672_s20 = scalar_lea.hbm %s2119_s13, 32 }
 0x107   : > { %v637_v16 = vpop.permute.xlu2 %636 }
 0x10f   : > { %v660_v21 = vpop.permute.xlu2 %659 }
 0x117   : > { %v749_v26 = vpop.permute.xlu2 %748 }
 0x11f   : > { %v639_v17 = vpop.permute.xlu1 %638  ;;  %v886_v31 = vpop.permute.xlu2 %885 }
 0x120   : > { %v524_v18 = vpop.permute.xlu0 %523  ;;  %v644_v19 = vsel %vm525_vm1, %v639_v17, 0  ;;  %v891_v34 = vsel %vm525_vm1, %v886_v31, 0 }
 0x121   : > { %v530_v20 = vsel %vm525_vm1, %v524_v18, 0  ;;  %653 = vmatpush.bf16.xpose.msrb.mxu0 %v644_v19 }
 0x122   : > { %539 = vmatpush.bf16.xpose.msra.mxu1 %v530_v20 }
 0x127   : > { %v662_v22 = vpop.permute.xlu1 %661 }
 0x128   : > { %v549_v23 = vpop.permute.xlu0 %548  ;;  %1386 = vmatmul.msk.bf16.vlgmr.msrb.gmra.mxu0 %vm525_vm1, %v637_v16  ;;  %v667_v24 = vsel %vm525_vm1, %v662_v22, 0 }
 0x129   : > { %1382 = vmatmul.msk.bf16.vlgmr.msra.gmra.mxu1 %vm525_vm1, %v518_v8  ;;  %v554_v25 = vsel %vm525_vm1, %v549_v23, 0 }
 0x12a   : > { %563 = vmatpush.bf16.xpose.msra.mxu2 %v554_v25  ;;  %676 = vmatpush.bf16.xpose.msrb.mxu1 %v667_v24 }
 0x12f   : > { %v774_v27 = vpop.permute.xlu1 %773 }
 0x130   : > { %v779_v28 = vsel %vm525_vm1, %v774_v27, 0  ;;  %v751_v29 = vpop.permute.xlu0 %750 }
 0x131   : > { %v756_v30 = vsel %vm525_vm1, %v751_v29, 0  ;;  %1383 = vmatmul.msk.bf16.vlgmr.msra.gmra.mxu2 %vm525_vm1, %v519_v13 }
 0x132   : > { %788 = vmatpush.bf16.xpose.msra.mxu1 %v779_v28  ;;  %765 = vmatpush.bf16.xpose.msra.mxu0 %v756_v30 }
 0x137   : > { %v863_v32 = vpop.permute.xlu1 %862 }
 0x138   : > { %v868_v33 = vsel %vm525_vm1, %v863_v32, 0  ;;  %v772_v35 = vpop.permute.xlu0 %771 }
 0x139   : > { %1387 = vmatmul.msk.bf16.vlgmr.msrb.gmra.mxu1 %vm525_vm1, %v660_v21  ;;  %1390 = vmatmul.msk.bf16.vlgmr.msra.gmra.mxu0 %vm525_vm1, %v749_v26 }
 0x13a   : > { %900 = vmatpush.bf16.xpose.msrb.mxu1 %v891_v34  ;;  %877 = vmatpush.bf16.xpose.msrb.mxu0 %v868_v33 }
 0x13f   : > { %v884_v37 = vpop.permute.xlu1 %883 }
 0x140   : > { %v861_v36 = vpop.permute.xlu0 %860 }
 0x149   : > { %1391 = vmatmul.msk.bf16.vlgmr.msra.gmra.mxu1 %vm525_vm1, %v772_v35  ;;  %1394 = vmatmul.msk.bf16.vlgmr.msrb.gmra.mxu0 %vm525_vm1, %v861_v36 }
 0x159   : > { %1395 = vmatmul.msk.bf16.vlgmr.msrb.gmra.mxu1 %vm525_vm1, %v884_v37 }
 0x1a5   : > { %v655_v38 = vpop.f32.mrf.mxu0 }
 0x1a6   : > { %v541_v39 = vpop.f32.mrf.mxu1  ;;  %v682_v40 = vsel %vm525_vm1, %v655_v38, -inf }
 0x1a7   : > { %683 = vmax.xlane.f32.xlu1 %v682_v40  ;;  %v569_v41 = vsel %vm525_vm1, %v541_v39, -inf }
 0x1a8   : > { %570 = vmax.xlane.f32.xlu2 %v569_v41 }
 0x1ad   : > { %v657_v42 = vpop.f32.mrf.mxu0 }
 0x1ae   : > { %v543_v43 = vpop.f32.mrf.mxu1 }
 0x1b4   : > { %v565_v44 = vpop.f32.mrf.mxu2 }
 0x1b5   : > { %v572_v45 = vsel %vm525_vm1, %v565_v44, -inf }
 0x1b6   : > { %v678_v46 = vpop.f32.mrf.mxu1  ;;  %573 = vmax.xlane.f32.xlu0 %v572_v45  ;;  %v1944_v47 = vpop.f32.mrf.mxu0 }
 0x1b7   : > { %v685_v48 = vsel %vm525_vm1, %v678_v46, -inf  ;;  %v794_v60 = vsel %vm525_vm1, %v1944_v47, -inf }
 0x1b8   : > { %686 = vmax.xlane.f32.xlu2 %v685_v48 }
 0x1bc   : > { %v567_v49 = vpop.f32.mrf.mxu2 }
 0x1be   : > { %v680_v50 = vpop.f32.mrf.mxu1  ;;  %v769_v51 = vpop.f32.mrf.mxu0 }
 0x1c0   : > { %615 = vrot.lane.b32.xlu1 %v1912_v15, %s1735_s23 }
 0x1c6   : > { %v1948_v52 = vpop.f32.mrf.mxu1  ;;  %v1950_v53 = vpop.f32.mrf.mxu0 }
 0x1c7   : > { %v797_v59 = vsel %vm525_vm1, %v1948_v52, -inf  ;;  %v906_v61 = vsel %vm525_vm1, %v1950_v53, -inf }
 0x1c8   : > { %727 = vrot.lane.b32.xlu1 %v1912_v15, %s1736_s24 }
 0x1ca   : > { %706 = vrot.lane.b32.xlu0 %v1907_v10, %s1736_s24  ;;  %s1274_s24 = scalar_lea.hbm %s2119_s13, %s1448_s17 }
 0x1ce   : > { %v792_v54 = vpop.f32.mrf.mxu1  ;;  %v881_v55 = vpop.f32.mrf.mxu0 }
 0x1d0   : > { %593 = vrot.lane.b32.xlu2 %v1907_v10, %s1735_s23 }
 0x1d6   : > { %v902_v56 = vpop.f32.mrf.mxu1 }
 0x1d7   : > { %v909_v58 = vsel %vm525_vm1, %v902_v56, -inf }
 0x1de   : > { %v904_v57 = vpop.f32.mrf.mxu1 }
 0x1f2   : > { %910 = vmax.xlane.f32.xlu1 %v909_v58 }
 0x1f4   : > { %798 = vmax.xlane.f32.xlu0 %v797_v59 }
 0x1f9   : > { %795 = vmax.xlane.f32.xlu2 %v794_v60 }
 0x1fc   : > { %907 = vmax.xlane.f32.xlu0 %v906_v61 }
 0x21a   : > { %v684_v62 = vpop.xlane.xlu1 %683 }
 0x21b   : > { %v688_v63 = vsub.f32 %v655_v38, %v684_v62  ;;  %v571_v0 = vpop.xlane.xlu2 %570 }
 0x21c   : > { %v575_v1 = vsub.f32 %v541_v39, %v571_v0 }
 0x21d   : > { %v690_v4 = vmul.f32 1.442695, %v688_v63 }
 0x21e   : > { %v577_v5 = vmul.f32 1.442695, %v575_v1 }
 0x21f   : > { %1550 = vpow2.f32 %v690_v4 }
 0x220   : > { %1552 = vpow2.f32 %v577_v5 }
 0x225   : > { %v1962_v6 = vpop.eup %1550 }
 0x226   : > { %v1964_v7 = vpop.eup %1552  ;;  %v694_v8 = vsel %vm525_vm1, %v1962_v6, 0.0 }
 0x227   : > { %v581_v9 = vsel %vm525_vm1, %v1964_v7, 0.0  ;;  %695 = vadd.xlane.f32.xlu0 %v694_v8 }
 0x228   : > { %582 = vadd.xlane.f32.xlu1 %v581_v9 }
 0x229   : > { %v574_v11 = vpop.xlane.xlu0 %573 }
 0x22a   : > { %v576_v12 = vsub.f32 %v565_v44, %v574_v11 }
 0x22b   : > { %v687_v13 = vpop.xlane.xlu2 %686 }
 0x22c   : > { %v579_v14 = vmul.f32 1.442695, %v576_v12  ;;  %v689_v16 = vsub.f32 %v678_v46, %v687_v13 }
 0x22e   : > { %1554 = vpow2.f32 %v579_v14  ;;  %v692_v17 = vmul.f32 1.442695, %v689_v16 }
 0x230   : > { %1556 = vpow2.f32 %v692_v17 }
 0x232   : > { %v616_v18 = vpop.permute.xlu1 %615 }
 0x233   : > { %v594_v19 = vpop.permute.xlu2 %593  ;;  %v621_v20 = vsel %vm598_vm2, %v616_v18, 0 }
 0x234   : > { %v1971_v21 = vpop.eup %1554  ;;  %v600_v22 = vsel %vm598_vm2, %v594_v19, 0 }
 0x235   : > { %609 = vmatpush.bf16.msra.mxu3 %v600_v22  ;;  %v584_v23 = vsel %vm525_vm1, %v1971_v21, 0.0 }
 0x236   : > { %v1976_v24 = vpop.eup %1556  ;;  %585 = vadd.xlane.f32.xlu0 %v584_v23 }
 0x237   : > { %v697_v25 = vsel %vm525_vm1, %v1976_v24, 0.0 }
 0x238   : > { %698 = vadd.xlane.f32.xlu2 %v697_v25 }
 0x239   : > { %630 = vmatpush.bf16.msrb.mxu3 %v621_v20 }
 0x23a   : > { %v728_v28 = vpop.permute.xlu1 %727 }
 0x23b   : > { %v733_v57 = vsel %vm598_vm2, %v728_v28, 0 }
 0x23c   : > { %v707_v26 = vpop.permute.xlu0 %706 }
 0x23d   : > { %v712_v27 = vsel %vm598_vm2, %v707_v26, 0 }
 0x23e   : > { %721 = vmatpush.bf16.msrb.mxu2 %v712_v27 }
 0x241   : > { %839 = vrot.lane.b32.xlu1 %v1912_v15, %s1737_s30 }
 0x250   : > { %818 = vrot.lane.b32.xlu2 %v1907_v10, %s1737_s30  ;;  %s466_s30 = sand.u32 1, %s1714_s26  }
 0x251   : > { %s1370_s14 = sshll.u32 %s466_s30, 4  ;;  %s1263_s29 = scalar_lea.sflag [#allocation4], %s466_s30 }
 0x252   : > { %s468_s19 = scalar_lea.vmem [#allocation7], %s1370_s14 }
 0x265   : > { %v911_v29 = vpop.xlane.xlu1 %910 }
 0x266   : > { %v913_v30 = vsub.f32 %v902_v56, %v911_v29 }
 0x267   : > { %v799_v31 = vpop.xlane.xlu0 %798 }
 0x268   : > { %v801_v32 = vsub.f32 %v1948_v52, %v799_v31  ;;  %v916_v34 = vmul.f32 1.442695, %v913_v30 }
 0x26a   : > { %v804_v33 = vmul.f32 1.442695, %v801_v32 }
 0x26c   : > { %1558 = vpow2.f32 %v804_v33  ;;  %v796_v35 = vpop.xlane.xlu2 %795 }
 0x26d   : > { %v800_v36 = vsub.f32 %v1944_v47, %v796_v35  ;;  %1560 = vpow2.f32 %v916_v34 }
 0x26f   : > { %v802_v37 = vmul.f32 1.442695, %v800_v36  ;;  %v908_v38 = vpop.xlane.xlu0 %907 }
 0x270   : > { %v912_v39 = vsub.f32 %v1950_v53, %v908_v38 }
 0x271   : > { %1562 = vpow2.f32 %v802_v37 }
 0x272   : > { %v1559_v40 = vpop.eup %1558  ;;  %v914_v41 = vmul.f32 1.442695, %v912_v39 }
 0x273   : > { %v809_v42 = vsel %vm525_vm1, %v1559_v40, 0.0  ;;  %v1987_v43 = vpop.eup %1560 }
 0x274   : > { %1564 = vpow2.f32 %v914_v41  ;;  %810 = vadd.xlane.f32.xlu0 %v809_v42  ;;  %v921_v46 = vsel %vm525_vm1, %v1987_v43, 0.0 }
 0x277   : > { %v1563_v44 = vpop.eup %1562 }
 0x278   : > { %v806_v45 = vsel %vm525_vm1, %v1563_v44, 0.0 }
 0x279   : > { %807 = vadd.xlane.f32.xlu1 %v806_v45  ;;  %922 = vadd.xlane.f32.xlu2 %v921_v46 }
 0x27a   : > { %v1565_v47 = vpop.eup %1564 }
 0x27b   : > { %v918_v48 = vsel %vm525_vm1, %v1565_v47, 0.0 }
 0x27c   : > { %919 = vadd.xlane.f32.xlu0 %v918_v48  ;;  %v1440_v48 = vld [vmem:[#allocation2] sm:$0xff] }
 0x290   : > { %930 = vrot.lane.b32.xlu0 %v1907_v10, %s1738_s15 }
 0x292   : > { %951 = vrot.lane.b32.xlu1 %v1912_v15, %s1738_s15  ;;  %s1275_s15 = sshll.u32 %s468_s19, 4  ;;  %s1276_s15 = int_to_ptr.vmem [resolvable:$true] %s1275_s15 }
 0x29a   : > { %v696_v49 = vpop.xlane.xlu0 %695 }
 0x29b   : > { %v583_v50 = vpop.xlane.xlu1 %582  ;;  %1566 = vrcp.f32 %v696_v49 }
 0x29c   : > { %1568 = vrcp.f32 %v583_v50 }
 0x2a1   : > { %v1567_v51 = vpop.eup %1566 }
 0x2a2   : > { %v1569_v52 = vpop.eup %1568  ;;  %v702_v53 = vmul.f32 %v1567_v51, %v1962_v6 }
 0x2a3   : > { %v589_v54 = vmul.f32 %v1569_v52, %v1964_v7 }
 0x2a4   : > { %v704_v55 = vpack.c.bf16 %v702_v53, %v702_v53 }
 0x2a5   : > { %v591_v56 = vpack.c.bf16 %v589_v54, %v589_v54 }
 0x2a6   : > { %1388 = vmatmul.msk.bf16.vlgmr.msrb.gmra.mxu2 %vm525_vm1, %v704_v55 }
 0x2a7   : > { %1384 = vmatmul.msk.bf16.vlgmr.msra.gmra.mxu3 %vm525_vm1, %v591_v56 }
 0x2a8   : > { %742 = vmatpush.bf16.msra.mxu3 %v733_v57 }
 0x2a9   : > { %v586_v10 = vpop.xlane.xlu0 %585 }
 0x2aa   : > { %1570 = vrcp.f32 %v586_v10 }
 0x2ab   : > { %v699_v15 = vpop.xlane.xlu2 %698 }
 0x2ac   : > { %1572 = vrcp.f32 %v699_v15 }
 0x2b0   : > { %v1571_v58 = vpop.eup %1570 }
 0x2b1   : > { %v590_v59 = vmul.f32 %v1571_v58, %v1971_v21 }
 0x2b2   : > { %v1573_v1 = vpop.eup %1572 }
 0x2b3   : > { %v819_v60 = vpop.permute.xlu2 %818  ;;  %v840_v62 = vpop.permute.xlu1 %839  ;;  %v592_v63 = vpack.c.bf16 %v590_v59, %v590_v59  ;;  %v703_v4 = vmul.f32 %v1573_v1, %v1976_v24 }
 0x2b4   : > { %v824_v61 = vsel %vm598_vm2, %v819_v60, 0  ;;  %v845_v0 = vsel %vm598_vm2, %v840_v62, 0 }
 0x2b5   : > { %833 = vmatpush.bf16.msra.mxu2 %v824_v61  ;;  %v705_v5 = vpack.c.bf16 %v703_v4, %v703_v4 }
 0x2b7   : > { %1385 = vmatmul.msk.bf16.vlgmr.msrb.gmra.mxu3 %vm525_vm1, %v592_v63  ;;  %v1543_v63 = vld [vmem:[%s2110_s4] ss:$0 sm:$0xff] }
 0x2b8   : > { %854 = vmatpush.bf16.msrb.mxu3 %v845_v0 }
 0x2c7   : > { %1389 = vmatmul.msk.bf16.vlgmr.msra.gmra.mxu3 %vm525_vm1, %v705_v5 }
 0x2e7   : > { %v811_v6 = vpop.xlane.xlu0 %810 }
 0x2e8   : > { %1574 = vrcp.f32 %v811_v6 }
 0x2ec   : > { %v808_v7 = vpop.xlane.xlu1 %807  ;;  %v923_v14 = vpop.xlane.xlu2 %922 }
 0x2ed   : > { %1576 = vrcp.f32 %v808_v7 }
 0x2ee   : > { %v1575_v8 = vpop.eup %1574  ;;  %1578 = vrcp.f32 %v923_v14 }
 0x2ef   : > { %v815_v9 = vmul.f32 %v1575_v8, %v1559_v40  ;;  %v920_v17 = vpop.xlane.xlu0 %919 }
 0x2f0   : > { %1580 = vrcp.f32 %v920_v17 }
 0x2f1   : > { %v817_v11 = vpack.c.bf16 %v815_v9, %v815_v9 }
 0x2f3   : > { %1393 = vmatmul.msk.bf16.vlgmr.msrb.gmra.mxu3 %vm525_vm1, %v817_v11  ;;  %v1577_v12 = vpop.eup %1576  ;;  %v1742_v11 = vmov 32.0  }
 0x2f4   : > { %v814_v13 = vmul.f32 %v1577_v12, %v1563_v44  ;;  %v1579_v18 = vpop.eup %1578  ;;  %1582 = vrcp.f32 %v1742_v11 }
 0x2f5   : > { %v927_v21 = vmul.f32 %v1579_v18, %v1987_v43 }
 0x2f6   : > { %v816_v16 = vpack.c.bf16 %v814_v13, %v814_v13  ;;  %v1581_v19 = vpop.eup %1580 }
 0x2f7   : > { %v926_v22 = vmul.f32 %v1581_v19, %v1565_v47  ;;  %v929_v26 = vpack.c.bf16 %v927_v21, %v927_v21  ;;  %v1441_v47 = vld [vmem:[#allocation2 + $0x8] sm:$0xff] }
 0x2f8   : > { %1392 = vmatmul.msk.bf16.vlgmr.msra.gmra.mxu2 %vm525_vm1, %v816_v16  ;;  %1034 = vmatpush.bf16.msra.mxu0 %v1441_v47  ;;  %v1544_v47 = vld [vmem:[%s2111_s5] ss:$0 sm:$0xff] }
 0x2f9   : > { %v928_v27 = vpack.c.bf16 %v926_v22, %v926_v22 }
 0x2fa   : > { %v1583_v12 = vpop.eup %1582 }
 0x2fb   : > { %v1051_v13 = vmul.f32 32.0, %v1583_v12  ;;  %vm1055_vm5 = vweird.f32 %v1583_v12 }
 0x2fc   : > { %1035 = vmatpush.bf16.msra.mxu0 %v1440_v48 }
 0x2fd   : > { %v1052_v14 = vsub.f32 1.0, %v1051_v13 }
 0x2ff   : > { %v1053_v16 = vmul.f32 %v1583_v12, %v1052_v14 }
 0x301   : > { %v1054_v17 = vadd.f32 %v1583_v12, %v1053_v16 }
 0x302   : > { %v931_v20 = vpop.permute.xlu0 %930 }
 0x303   : > { %v936_v23 = vsel %vm598_vm2, %v931_v20, 0  ;;  %v2024_v18 = vsel %vm1055_vm5, %v1583_v12, %v1054_v17 }
 0x304   : > { %v952_v24 = vpop.permute.xlu1 %951  ;;  %945 = vmatpush.bf16.msrb.mxu2 %v936_v23 }
 0x305   : > { %v957_v25 = vsel %vm598_vm2, %v952_v24, 0 }
 0x306   : > { %966 = vmatpush.bf16.msra.mxu3 %v957_v25 }
 0x308   : > { %1396 = vmatmul.msk.bf16.vlgmr.msrb.gmra.mxu2 %vm525_vm1, %v928_v27  ;;  %v1443_v27 = vld [vmem:[#allocation5 + $0x8] sm:$0xff] }
 0x309   : > { %1397 = vmatmul.msk.bf16.vlgmr.msra.gmra.mxu3 %vm525_vm1, %v929_v26  ;;  %1137 = vmatpush.bf16.msra.mxu1 %v1443_v27 }
 0x329   : > { %v723_v28 = vpop.f32.mrf.mxu2 }
 0x32a   : > { %v611_v29 = vpop.f32.mrf.mxu3 }
 0x331   : > { %v725_v30 = vpop.f32.mrf.mxu2 }
 0x332   : > { %v613_v31 = vpop.f32.mrf.mxu3 }
 0x333   : > { %v1442_v31 = vld [vmem:[#allocation5] sm:$0xff] }
 0x334   : > { %1138 = vmatpush.bf16.msra.mxu1 %v1442_v31 }
 0x33a   : > { %v632_v32 = vpop.f32.mrf.mxu3 }
 0x342   : > { %v634_v33 = vpop.f32.mrf.mxu3 }
 0x34a   : > { %v744_v34 = vpop.f32.mrf.mxu3 }
 0x34b   : > { %v1527_v35 = vpack.i.bf16 %v744_v34, %v723_v28 }
 0x34d   : > { %1528 = vrot.lane.b32.xlu0 %v1527_v35, %s1739_s16 }
 0x352   : > { %v746_v36 = vpop.f32.mrf.mxu3 }
 0x376   : > { %v856_v37 = vpop.f32.mrf.mxu3 }
 0x37b   : > { %v835_v38 = vpop.f32.mrf.mxu2 }
 0x37c   : > { %v1532_v39 = vpack.i.bf16 %v856_v37, %v835_v38 }
 0x37e   : > { %v858_v40 = vpop.f32.mrf.mxu3  ;;  %1533 = vrot.lane.b32.xlu1 %v1532_v39, %s1740_s21  ;;  %s1277_s21 = sshll.u32 %s1274_s24, 4  ;;  %s1278_s21 = int_to_ptr.hbm [resolvable:$true] %s1277_s21 }
 0x383   : > { %v837_v41 = vpop.f32.mrf.mxu2 }
 0x38b   : > { %v947_v42 = vpop.f32.mrf.mxu2 }
 0x38c   : > { %v968_v43 = vpop.f32.mrf.mxu3 }
 0x38d   : > { %v1537_v44 = vpack.i.bf16 %v968_v43, %v947_v42 }
 0x38f   : > { %1538 = vrot.lane.b32.xlu0 %v1537_v44, %s1741_s22  ;;  %s1666_s22 = sshra.s32 %s1278_s21, 4  ;;  %s1667_s22 = int_to_ptr.hbm [resolvable:$true] %s1666_s22 }
 0x390   : > { %s1668_s27 = scalar_lea.hbm %s1667_s22, 16  ;;  %p1673_p3 = scmp.lt.s32.totalorder %s1667_s22, %s2119_s13 }
 0x391   : > { %p1669_p0 = scmp.ne.s32.totalorder %s1667_s22, %s1668_s27  ;;  %p1674_p4 = scmp.lt.s32.totalorder %s1672_s20, %s1668_s27 }
 0x393   : > { %v949_v45 = vpop.f32.mrf.mxu2  ;;  %p1670_p1 = pnand %p1669_p0, %p1852_p5  ;;  %p1675_p7 = por %p1674_p4, %p1673_p3 }
 0x394   : > { %v970_v46 = vpop.f32.mrf.mxu3 }
 0x395   : > { %p1671_p2 = pneg %p1670_p1 }
 0x397   : > { %p1676_p8 = pnand %p1675_p7, %p1671_p2 }
 0x3bf   : > { %v1529_v49 = vpop.permute.xlu0 %1528 }
 0x3c0   : > { %v1531_v51 = vunpack.i.h.bf16 %v1529_v49  ;;  %v1530_v52 = vunpack.i.l.bf16 %v1529_v49 }
 0x3c2   : > { %v997_v56 = vsel %vm525_vm1, %v632_v32, %v1531_v51  ;;  %v996_v57 = vsel %vm525_vm1, %v611_v29, %v1530_v52  ;;  %v1545_v51 = vld [vmem:[%s2112_s6] ss:$0 sm:$0xff] }
 0x3f0   : > { %v1534_v50 = vpop.permute.xlu1 %1533 }
 0x3f1   : > { %v1536_v53 = vunpack.i.h.bf16 %v1534_v50  ;;  %v1535_v54 = vunpack.i.l.bf16 %v1534_v50 }
 0x3f3   : > { %v999_v58 = vsel %vm998_vm3, %v996_v57, %v1535_v54  ;;  %v1000_v59 = vsel %vm998_vm3, %v997_v56, %v1536_v53 }
 0x401   : > { %v1539_v55 = vpop.permute.xlu0 %1538 }
 0x402   : > { %v1541_v10 = vunpack.i.h.bf16 %v1539_v55  ;;  %v1540_v15 = vunpack.i.l.bf16 %v1539_v55 }
 0x404   : > { %v1002_v60 = vsel %vm1001_vm4, %v999_v58, %v1540_v15  ;;  %v1003_v61 = vsel %vm1001_vm4, %v1000_v59, %v1541_v10  ;;  %v1447_v10 = vld [vmem:[%s2115_s9 + $0x18] sm:$0xff]  ;;  %v1446_v15 = vld [vmem:[%s2115_s9 + $0x10] sm:$0xff]  ;;  %v1445_v58 = vld [vmem:[%s2115_s9 + $0x8] sm:$0xff] }
 0x405   : > { %v1004_v62 = vpack.c.bf16 %v1003_v61, %v1002_v60  ;;  %1192 = vmatpush.bf16.msra.mxu2 %v1447_v10  ;;  %v1444_v59 = vld [vmem:[%s2115_s9] sm:$0xff] }
 0x406   : > { %v1546_v61 = vld [vmem:[%s2114_s8] ss:$0 sm:$0xff] }
 0x407   : > { %1406 = vmatmul.msk.bf16.vlgmr.msra.gmra.mxu0 %vm500_vm0, %v1004_v62 }
 0x409   : > { %1193 = vmatpush.bf16.msra.mxu2 %v1446_v15 }
 0x40d   : > { %1194 = vmatpush.bf16.msra.mxu2 %v1445_v58 }
 0x411   : > { %1195 = vmatpush.bf16.msra.mxu2 %v1444_v59 }
 0x484   : > { %v1037_v0 = vpop.f32.mrf.mxu0 }
 0x485   : > { %v1038_v1 = vadd.f32 %v1543_v63, %v1037_v0 }
 0x487   : > { %v1042_v4 = vadd.f32 %v1038_v1, %v1897_v2 }
 0x489   : > { %v1044_v5 = vsel %vm500_vm0, %v1042_v4, 0.0 }
 0x48a   : > { %1045 = vadd.xlane.f32.xlu1 %v1044_v5 }
 0x48c   : > { %v1039_v6 = vpop.f32.mrf.mxu0 }
 0x48d   : > { %v1040_v7 = vadd.f32 %v1543_v63, %v1039_v6  ;;  %v1547_v6 = vld [vmem:[%s2116_s10] ss:$0 sm:$0xff] }
 0x48f   : > { %v1043_v8 = vadd.f32 %v1040_v7, %v1899_v3 }
 0x491   : > { %v1047_v9 = vsel %vm500_vm0, %v1043_v8, 0.0 }
 0x492   : > { %1048 = vadd.xlane.f32.xlu2 %v1047_v9 }
 0x4fd   : > { %v1046_v2 = vpop.xlane.xlu1 %1045 }
 0x4fe   : > { %v1057_v19 = vmul.f32 %v2024_v18, %v1046_v2 }
 0x500   : > { %v1059_v20 = vsub.f32 %v1042_v4, %v1057_v19 }
 0x502   : > { %v1061_v21 = vmul.f32 %v1059_v20, %v1059_v20 }
 0x504   : > { %v1063_v3 = vsel %vm500_vm0, %v1061_v21, 0.0 }
 0x505   : > { %v1049_v22 = vpop.xlane.xlu2 %1048  ;;  %1064 = vadd.xlane.f32.xlu0 %v1063_v3 }
 0x506   : > { %v1058_v23 = vmul.f32 %v2024_v18, %v1049_v22 }
 0x508   : > { %v1060_v24 = vsub.f32 %v1043_v8, %v1058_v23 }
 0x50a   : > { %v1062_v25 = vmul.f32 %v1060_v24, %v1060_v24 }
 0x50c   : > { %v1066_v26 = vsel %vm500_vm0, %v1062_v25, 0.0 }
 0x50d   : > { %1067 = vadd.xlane.f32.xlu2 %v1066_v26 }
 0x578   : > { %v1065_v28 = vpop.xlane.xlu0 %1064 }
 0x579   : > { %v1069_v29 = vmul.f32 %v1065_v28, %v2024_v18 }
 0x57b   : > { %v1071_v30 = vadd.f32 1e-06, %v1069_v29 }
 0x57d   : > { %1584 = vrsqrt.f32 %v1071_v30  ;;  %vm1079_vm7 = vweird.f32 %v1071_v30 }
 0x580   : > { %v1068_v32 = vpop.xlane.xlu2 %1067 }
 0x581   : > { %v1070_v33 = vmul.f32 %v1068_v32, %v2024_v18 }
 0x583   : > { %v1585_v34 = vpop.eup %1584  ;;  %v1072_v35 = vadd.f32 1e-06, %v1070_v33 }
 0x584   : > { %v1074_v36 = vmul.f32 %v1585_v34, %v1071_v30  ;;  %vm1080_vm6 = vweird.f32 %v1585_v34 }
 0x585   : > { %1586 = vrsqrt.f32 %v1072_v35  ;;  %vm1081_vm8 = vmor %vm1079_vm7, %vm1080_vm6  ;;  %vm1089_vm10 = vweird.f32 %v1072_v35 }
 0x586   : > { %v1075_v37 = vmul.f32 %v1585_v34, %v1074_v36 }
 0x588   : > { %v1076_v38 = vmul.f32 0.5, %v1075_v37 }
 0x58a   : > { %v1077_v39 = vsub.f32 1.5, %v1076_v38 }
 0x58b   : > { %v1587_v40 = vpop.eup %1586 }
 0x58c   : > { %v1078_v41 = vmul.f32 %v1585_v34, %v1077_v39  ;;  %v1084_v42 = vmul.f32 %v1587_v40, %v1072_v35  ;;  %vm1090_vm9 = vweird.f32 %v1587_v40 }
 0x58d   : > { %vm1091_vm11 = vmor %vm1089_vm10, %vm1090_vm9 }
 0x58e   : > { %v1085_v43 = vmul.f32 %v1587_v40, %v1084_v42  ;;  %v1082_v44 = vsel %vm1081_vm8, %v1585_v34, %v1078_v41  ;;  %v1549_v42 = vld [vmem:[%s2118_s12] ss:$0 sm:$0xff] }
 0x58f   : > { %v1093_v48 = vmul.f32 %v1082_v44, %v1059_v20 }
 0x590   : > { %v1086_v45 = vmul.f32 0.5, %v1085_v43 }
 0x591   : > { %v1099_v52 = vmul.f32 %v1544_v47, %v1093_v48 }
 0x592   : > { %v1087_v46 = vsub.f32 1.5, %v1086_v45 }
 0x593   : > { %v1105_v55 = vadd.f32 %v1545_v51, %v1099_v52 }
 0x594   : > { %v1088_v49 = vmul.f32 %v1587_v40, %v1087_v46 }
 0x596   : > { %v1092_v50 = vsel %vm1091_vm11, %v1587_v40, %v1088_v49  ;;  %v1548_v40 = vld [vmem:[%s2117_s11] ss:$0 sm:$0xff] }
 0x597   : > { %v1094_v53 = vmul.f32 %v1092_v50, %v1060_v24 }
 0x599   : > { %v1100_v54 = vmul.f32 %v1544_v47, %v1094_v53 }
 0x59b   : > { %v1106_v56 = vadd.f32 %v1545_v51, %v1100_v54 }
 0x59d   : > { %v1107_v57 = vpack.c.bf16 %v1106_v56, %v1105_v55 }
 0x59f   : > { %1415 = vmatmul.msk.bf16.vlgmr.msra.gmra.mxu1 %vm500_vm0, %v1107_v57 }
 0x61c   : > { %v1140_v60 = vpop.f32.mrf.mxu1 }
 0x61d   : > { %v1141_v62 = vadd.f32 %v1546_v61, %v1140_v60 }
 0x61f   : > { %v1145_v1 = vmax.f32 %v1141_v62, 0.0 }
 0x624   : > { %v1142_v63 = vpop.f32.mrf.mxu1 }
 0x625   : > { %v1143_v0 = vadd.f32 %v1546_v61, %v1142_v63 }
 0x627   : > { %v1146_v4 = vmax.f32 %v1143_v0, 0.0 }
 0x629   : > { %v1147_v5 = vpack.c.bf16 %v1146_v4, %v1145_v1 }
 0x62b   : > { %1432 = vmatmul.msk.bf16.vlgmr.msra.gmra.mxu2 %vm1184_vm12, %v1147_v5 }
 0x6ae   : > { %v1197_v7 = vpop.f32.mrf.mxu2 }
 0x6af   : > { %v1198_v8 = vadd.f32 %v1547_v6, %v1197_v7 }
 0x6b1   : > { %v1202_v9 = vadd.f32 %v1198_v8, %v1105_v55 }
 0x6b3   : > { %v1204_v11 = vsel %vm500_vm0, %v1202_v9, 0.0 }
 0x6b4   : > { %1205 = vadd.xlane.f32.xlu2 %v1204_v11 }
 0x6b6   : > { %v1199_v12 = vpop.f32.mrf.mxu2 }
 0x6b7   : > { %v1200_v13 = vadd.f32 %v1547_v6, %v1199_v12 }
 0x6b9   : > { %v1203_v14 = vadd.f32 %v1200_v13, %v1106_v56 }
 0x6bb   : > { %v1207_v16 = vsel %vm500_vm0, %v1203_v14, 0.0 }
 0x6bc   : > { %1208 = vadd.xlane.f32.xlu2 %v1207_v16 }
 0x727   : > { %v1206_v17 = vpop.xlane.xlu2 %1205 }
 0x728   : > { %v1210_v2 = vmul.f32 %v1206_v17, %v2024_v18 }
 0x72a   : > { %v1212_v19 = vsub.f32 %v1202_v9, %v1210_v2 }
 0x72c   : > { %v1214_v20 = vmul.f32 %v1212_v19, %v1212_v19 }
 0x72e   : > { %v1216_v21 = vsel %vm500_vm0, %v1214_v20, 0.0 }
 0x72f   : > { %1217 = vadd.xlane.f32.xlu2 %v1216_v21  ;;  %v1209_v3 = vpop.xlane.xlu2 %1208 }
 0x730   : > { %v1211_v22 = vmul.f32 %v1209_v3, %v2024_v18 }
 0x732   : > { %v1213_v23 = vsub.f32 %v1203_v14, %v1211_v22 }
 0x734   : > { %v1215_v24 = vmul.f32 %v1213_v23, %v1213_v23 }
 0x736   : > { %v1219_v25 = vsel %vm500_vm0, %v1215_v24, 0.0 }
 0x737   : > { %1220 = vadd.xlane.f32.xlu1 %v1219_v25 }
 0x7a2   : > { %v1218_v26 = vpop.xlane.xlu2 %1217 }
 0x7a3   : > { %v1222_v27 = vmul.f32 %v1218_v26, %v2024_v18 }
 0x7a5   : > { %v1224_v28 = vadd.f32 1e-06, %v1222_v27 }
 0x7a7   : > { %1588 = vrsqrt.f32 %v1224_v28  ;;  %vm1232_vm14 = vweird.f32 %v1224_v28 }
 0x7aa   : > { %v1221_v29 = vpop.xlane.xlu1 %1220 }
 0x7ab   : > { %v1223_v30 = vmul.f32 %v1221_v29, %v2024_v18 }
 0x7ad   : > { %v1589_v31 = vpop.eup %1588  ;;  %v1225_v32 = vadd.f32 1e-06, %v1223_v30 }
 0x7ae   : > { %v1227_v33 = vmul.f32 %v1589_v31, %v1224_v28  ;;  %vm1233_vm13 = vweird.f32 %v1589_v31 }
 0x7af   : > { %1590 = vrsqrt.f32 %v1225_v32  ;;  %vm1234_vm15 = vmor %vm1232_vm14, %vm1233_vm13  ;;  %vm1242_vm2 = vweird.f32 %v1225_v32 }
 0x7b0   : > { %v1228_v34 = vmul.f32 %v1589_v31, %v1227_v33 }
 0x7b2   : > { %v1229_v35 = vmul.f32 0.5, %v1228_v34 }
 0x7b4   : > { %v1230_v36 = vsub.f32 1.5, %v1229_v35 }
 0x7b5   : > { %v1591_v37 = vpop.eup %1590 }
 0x7b6   : > { %v1231_v38 = vmul.f32 %v1589_v31, %v1230_v36  ;;  %v1237_v39 = vmul.f32 %v1591_v37, %v1225_v32  ;;  %vm1243_vm1 = vweird.f32 %v1591_v37 }
 0x7b7   : > { %vm1244_vm3 = vmor %vm1242_vm2, %vm1243_vm1 }
 0x7b8   : > { %v1235_v18 = vsel %vm1234_vm15, %v1589_v31, %v1231_v38  ;;  %v1238_v41 = vmul.f32 %v1591_v37, %v1237_v39 }
 0x7b9   : > { %v1246_v43 = vmul.f32 %v1235_v18, %v1212_v19 }
 0x7ba   : > { %v1239_v44 = vmul.f32 0.5, %v1238_v41 }
 0x7bb   : > { %v1252_v45 = vmul.f32 %v1548_v40, %v1246_v43 }
 0x7bc   : > { %v1240_v46 = vsub.f32 1.5, %v1239_v44 }
 0x7bd   : > { %v1258_v47 = vadd.f32 %v1549_v42, %v1252_v45 }
 0x7be   : > { %v1241_v48 = vmul.f32 %v1591_v37, %v1240_v46 }
 0x7bf   : > { %1260 = vst.msk [vmem:[%s468_s19] sm:$0xff] %vm500_vm0, %v1258_v47 }
 0x7c0   : > { %v1245_v49 = vsel %vm1244_vm3, %v1591_v37, %v1241_v48 }
 0x7c1   : > { %v1247_v50 = vmul.f32 %v1245_v49, %v1213_v23 }
 0x7c3   : > { %v1253_v51 = vmul.f32 %v1548_v40, %v1247_v50 }
 0x7c5   : > { %v1259_v52 = vadd.f32 %v1549_v42, %v1253_v51 }
 0x7c7   : > { %1261 = vst.msk [vmem:[%s468_s19 + $0x8] sm:$0xff] %vm500_vm0, %v1259_v52 }
 0x7c8   : > { %1679 = shalt.err (!%p1676_p8)
}
 0x7c9   : > { %s1743_s30 = smov 128  }
 0x7ca   : > { %1457 = dma.vmem_to_hbm [thread:$0]  (%p1852_p5), %s1276_s15, 256, %s1278_s21, %s1263_s29, %s1743_s30, %s1743_s30, %s1739_s16  }
 0x7cb PF: > { %p1474_p9 = scmp.ge.s32.totalorder %s1722_s28, 2  ;;  %s1292_s14 = sand.u32 1, %s1710_s25  }
 0x7cc   : > { %s1293_s17 = scalar_lea.sflag [#allocation4], %s1292_s14 }
 0x7cd   : > { %p1467_p10 = pnand %p1474_p9, %p1856_p6 }
 0x7cf   : > { %p1468_p11 = pneg %p1467_p10 }
 0x7d1   : > { %1705 = dma.done.wait (%p1468_p11), %s1293_s17, 256  }
 0x7d2   : > { %1707 = vsyncadd (%p1468_p11), %s1293_s17, 4294967040  ;;  %s2132_s28 = sld [smem:[#allocation12_spill]]  ;;  %s2135_s25 = smov %s1714_s26 }
 0x7d3   : > { %s2133_s22 = sld [smem:[#allocation11_spill]] }
 0x7d4   : > { %s2134_s27 = sld [smem:[#allocation13_spill]] }
 0x7d8   : > { %p25_p12 = scmp.ge.s32.totalorder %s2132_s28, 4  }
 0x7d9   : > { %s2136_s26 = smov %s2133_s22 }
 0x7da   :  { %27 = sbr.rel (!%p25_p12) target bundleno = 5 (0x5), region = 116 }
 0x7df   :  { %1299 = vsyncpa [#allocation3], 1 }
 0x7e0   :  { %1301 = vsyncpa [#allocation3 + $0x1], 1 }
 0x7e1   :  { %1302 = vsyncpa [#allocation6], 1 }
 0x7e2   :  { %1303 = vsyncpa [#allocation4], 1 }
 0x7e3   :  { %1305 = vsyncpa [#allocation4 + $0x1], 1 }

</bundles_post_ra>
